<compile_context>
chip_gen: v7x
topology: tpu7x:2x2x1
jax: 0.10.0
libtpu: 0.0.40
codegen_flags: <defaults>
</compile_context>

<pallas_src>
import functools

import jax
import jax.numpy as jnp
import numpy as np
from jax.experimental import pallas as pl
from jax.experimental.pallas import tpu as pltpu

_BF16 = jnp.bfloat16
_F32 = jnp.float32


# ----------------------------------------------------------------------------
# elementwise / matmul helpers used inside the kernel
# ----------------------------------------------------------------------------
def _gelu(x):
    # tanh-form GELU: mul/add on the VPU, tanh on the EUP (otherwise-idle slot).
    c = 0.7978845608028654  # sqrt(2/pi)
    return 0.5 * x * (1.0 + jnp.tanh(c * (x + 0.044715 * (x * x * x))))


def _sigmoid(x):
    # exp + approximate reciprocal both run on the EUP, relieving the VALU.
    return pl.reciprocal(1.0 + jnp.exp(-x), approx=True)


def _mxu(w_bf16, act):
    # bf16 x bf16 operands -> f32 accumulation on the MXU.
    return jnp.dot(w_bf16, act.astype(_BF16), preferred_element_type=_F32)


# ----------------------------------------------------------------------------
# Pallas kernel: one grid step == TB batch elements, data stays in (C, L)
# ----------------------------------------------------------------------------
def _enhanced_kernel(has_shortcut, tb, l_valid, *refs):
    (x_ref, c_ref,
     bn1s_ref, bn1b_ref, w1_ref, b1_ref, w2_ref, b2_ref,
     wa1_ref, ba1_ref, wa2_ref, ba2_ref,
     ws1_ref, bs1_ref, ws2_ref, bs2_ref,
     wc1_ref, bc1_ref, wc2_ref, bc2_ref) = refs[:20]
    wsc_ref = refs[20] if has_shortcut else None
    scale_ref = refs[-2]
    out_ref = refs[-1]

    # Hoist weight/bias loads out of the per-batch loop (no per-iter reloads).
    bn1s, bn1b = bn1s_ref[...], bn1b_ref[...]
    w1, b1 = w1_ref[...], b1_ref[...]
    w2, b2 = w2_ref[...], b2_ref[...]
    wa1, ba1 = wa1_ref[...], ba1_ref[...]
    wa2, ba2 = wa2_ref[...], ba2_ref[...]
    ws1, bs1 = ws1_ref[...], bs1_ref[...]
    ws2, bs2 = ws2_ref[...], bs2_ref[...]
    wc1, bc1 = wc1_ref[...], bc1_ref[...]
    wc2, bc2 = wc2_ref[...], bc2_ref[...]
    wsc = wsc_ref[...] if has_shortcut else None
    scale = scale_ref[...]                                # (1, 1), broadcasts

    l_pad = x_ref.shape[-1]
    if l_pad != l_valid:
        lane = jax.lax.broadcasted_iota(jnp.int32, (1, l_pad), 1)
        lmask = (lane < l_valid).astype(_F32)             # mask padded lanes
    else:
        lmask = None
    inv_l = 1.0 / float(l_valid)

    # ---- pass 1: main path + attention gate + per-b pooled vector
    mains, pools = [], []
    for b in range(tb):
        x = x_ref[b]                                      # (Cin, L) f32
        g = _gelu(x * bn1s + bn1b)                        # BN1 -> GELU
        h = _mxu(w1, g) + b1                              # conv1 (BN2 folded)
        main = _mxu(w2, _gelu(h)) + b2                    # GELU -> conv2
        a = _gelu(_mxu(wa1, main) + ba1)                  # attention gate
        main = main * _sigmoid(_mxu(wa2, a) + ba2)
        pm = main if lmask is None else main * lmask
        pools.append(jnp.sum(pm, axis=1, keepdims=True) * inv_l)  # (Cout, 1)
        mains.append(main)

    # ---- squeeze-excite once per step: RHS has TB lanes instead of 1
    pooled = pools[0] if tb == 1 else jnp.concatenate(pools, axis=1)  # (Cout,TB)
    s = _gelu(_mxu(ws1, pooled) + bs1)
    s = _sigmoid(_mxu(ws2, s) + bs2)                      # (Cout, TB)

    # ---- pass 2: condition path + skip + combine + store
    for b in range(tb):
        cond = _mxu(wc2, _gelu(_mxu(wc1, c_ref[b]) + bc1)) + bc2
        skip = _mxu(wsc, x_ref[b]) if has_shortcut else x_ref[b]   # exact f32 id
        se_b = s if tb == 1 else s[:, b:b + 1]
        out_ref[b] = ((skip + mains[b] * se_b + cond) * scale).astype(out_ref.dtype)


# ----------------------------------------------------------------------------
# wrapper: parameter folding (BN->scale/shift, BN2 into conv1), pallas_call
# ----------------------------------------------------------------------------
def enhanced_forward(x_ncl, c_ncl, params, *, out_dtype=_BF16):
    """x_ncl: (B, size_in, L), c_ncl: (B, c_dim, L) -> (B, size_out, L).

    out_dtype defaults to bf16 (halves writeback HBM traffic); pass jnp.float32
    for exact dtype parity with the PyTorch module.
    """
    B, Cin, L = x_ncl.shape
    Cd = c_ncl.shape[1]
    Cout, size_h = params["w2"].shape
    has_shortcut = "w_sc" in params

    eps = 1e-5
    bn1s = (params["bn1_gamma"] / jnp.sqrt(params["bn1_var"] + eps)).astype(_F32)
    bn1b = (params["bn1_beta"] - params["bn1_mean"] * bn1s).astype(_F32)
    bn2s = params["bn2_gamma"] / jnp.sqrt(params["bn2_var"] + eps)
    bn2b = params["bn2_beta"] - params["bn2_mean"] * bn2s
    # Fold BN2 into conv1 (BN2 acts on conv1's output channels).
    w1f = params["w1"] * bn2s[:, None]
    b1f = params["b1"] * bn2s + bn2b

    col = lambda v: v.astype(_F32).reshape(-1, 1)   # per-channel column (C, 1)
    wt = lambda w: w.astype(_BF16)                  # bf16 MXU operand

    const_args = [
        col(bn1s), col(bn1b),
        wt(w1f), col(b1f),
        wt(params["w2"]), col(params["b2"]),
        wt(params["wa1"]), col(params["ba1"]),
        wt(params["wa2"]), col(params["ba2"]),
        wt(params["ws1"]), col(params["bs1"]),
        wt(params["ws2"]), col(params["bs2"]),
        wt(params["wc1"]), col(params["bc1"]),
        wt(params["wc2"]), col(params["bc2"]),
    ]
    if has_shortcut:
        const_args.append(wt(params["w_sc"]))           # Conv1d(..., bias=False)
    const_args.append(params["output_scale"].astype(_F32).reshape(1, 1))

    # ---- batch tile: largest divisor of B that is <= 8 (amortize step overhead)
    TB = 1
    for t in range(min(B, 8), 0, -1):
        if B % t == 0:
            TB = t
            break

    # ---- pad L to a lane multiple so output stores are lane-dense/unmasked
    L_pad = max(((L + 127) // 128) * 128, 128)
    x_in = x_ncl.astype(_F32)       # no wrapper-side bf16 cast (extra HBM pass)
    c_in = c_ncl.astype(_F32)
    if L_pad != L:
        x_in = jnp.pad(x_in, ((0, 0), (0, 0), (0, L_pad - L)))
        c_in = jnp.pad(c_in, ((0, 0), (0, 0), (0, L_pad - L)))

    # ---- VMEM budget: double-buffered x/c/out blocks + weights + f32
    #      intermediates, clamped generation-aware with physical headroom.
    out_isz = jnp.dtype(out_dtype).itemsize
    weight_bytes = sum(int(w.size) * w.dtype.itemsize for w in const_args)
    block_bytes = 2 * TB * L_pad * (Cin * 4 + Cd * 4 + Cout * out_isz)
    act_bytes = (TB + 8) * L_pad * max(size_h, Cout, Cin, Cd) * 4
    needed = block_bytes + 2 * weight_bytes + act_bytes + (4 << 20)
    try:
        vmem_cap = int(pltpu.get_tpu_info().vmem_capacity_bytes)
    except Exception:
        vmem_cap = 64 << 20          # conservative if the query is unavailable
    vmem_limit = int(max(min(needed, vmem_cap - (16 << 20)), 16 << 20))
    # TODO(synk): for very long L that overflows even this clamped budget, tile
    # L with an SE-pool accumulator pass + finalize pass instead of one L slab.

    # ---- advisory cost estimate so XLA schedules around the custom call
    flops = 2 * B * L_pad * (Cin * size_h + size_h * Cout
                             + 2 * Cout * max(Cout // 4, 1)
                             + Cd * max(Cd // 2, 1) + max(Cd // 2, 1) * Cout
                             + (Cin * Cout if has_shortcut else 0))
    flops += 4 * B * Cout * max(Cout // 8, 1)
    transc = B * L_pad * (Cin + size_h + max(Cout // 4, 1) + Cout
                          + max(Cd // 2, 1)) + B * (max(Cout // 8, 1) + Cout)
    bytes_acc = int(x_in.size) * 4 + int(c_in.size) * 4 + weight_bytes \
        + B * Cout * L_pad * out_isz
    cost = pl.CostEstimate(flops=int(flops), transcendentals=int(transc),
                           bytes_accessed=int(bytes_acc))

    kernel = functools.partial(_enhanced_kernel, has_shortcut, TB, L)

    # Constant operands: full-shape blocks with a constant index map, so they
    # are effectively DMA'd once (same block index every step).
    # TODO(synk): pipeline_mode=pl.Buffered(1) would halve the (already tiny)
    # weight VMEM footprint; left at the default for lowering robustness.
    def const_spec(arr):
        nd = arr.ndim
        return pl.BlockSpec(arr.shape, lambda b, _nd=nd: (0,) * _nd)

    x_spec = pl.BlockSpec((TB, Cin, L_pad), lambda b: (b, 0, 0))
    c_spec = pl.BlockSpec((TB, Cd, L_pad), lambda b: (b, 0, 0))
    out_spec = pl.BlockSpec((TB, Cout, L_pad), lambda b: (b, 0, 0))

    out = pl.pallas_call(
        kernel,
        out_shape=jax.ShapeDtypeStruct((B, Cout, L_pad), out_dtype),
        grid_spec=pltpu.PrefetchScalarGridSpec(
            num_scalar_prefetch=0,
            grid=(B // TB,),
            in_specs=[x_spec, c_spec] + [const_spec(w) for w in const_args],
            out_specs=out_spec),
        compiler_params=pltpu.CompilerParams(
            dimension_semantics=("parallel",),
            vmem_limit_bytes=vmem_limit),
        cost_estimate=cost,
    )(x_in, c_in, *const_args)

    if L_pad != L:
        out = out[:, :, :L]
    return out


# ----------------------------------------------------------------------------
# deterministic synthetic parameters (torch Conv1d orientation: (out, in))
# ----------------------------------------------------------------------------
def init_params(key, c_dim, size_in, size_h, size_out):
    ks = jax.random.split(key, 25)
    w = lambda k, shape: 0.1 * jax.random.normal(k, shape, dtype=_F32)
    p = dict(
        bn1_gamma=1.0 + 0.1 * jax.random.normal(ks[0], (size_in,), _F32),
        bn1_beta=w(ks[1], (size_in,)),
        bn1_mean=w(ks[2], (size_in,)),
        bn1_var=jax.random.uniform(ks[3], (size_in,), _F32, 0.5, 1.5),
        w1=w(ks[4], (size_h, size_in)), b1=w(ks[5], (size_h,)),
        bn2_gamma=1.0 + 0.1 * jax.random.normal(ks[6], (size_h,), _F32),
        bn2_beta=w(ks[7], (size_h,)),
        bn2_mean=w(ks[8], (size_h,)),
        bn2_var=jax.random.uniform(ks[9], (size_h,), _F32, 0.5, 1.5),
        w2=w(ks[10], (size_out, size_h)), b2=w(ks[11], (size_out,)),
        wa1=w(ks[12], (size_out // 4, size_out)), ba1=w(ks[13], (size_out // 4,)),
        wa2=w(ks[14], (size_out, size_out // 4)), ba2=w(ks[15], (size_out,)),
        ws1=w(ks[16], (size_out // 8, size_out)), bs1=w(ks[17], (size_out // 8,)),
        ws2=w(ks[18], (size_out, size_out // 8)), bs2=w(ks[19], (size_out,)),
        wc1=w(ks[20], (c_dim // 2, c_dim)), bc1=w(ks[21], (c_dim // 2,)),
        wc2=w(ks[22], (size_out, c_dim // 2)), bc2=w(ks[23], (size_out,)),
        output_scale=jnp.ones((1,), _F32),
    )
    if size_in != size_out:
        p["w_sc"] = w(ks[24], (size_out, size_in))      # Conv1d(..., bias=False)
    return p


# ----------------------------------------------------------------------------
# pure-JAX f32 reference (same eval-mode semantics, exact erf GELU)
# ----------------------------------------------------------------------------
def reference(x_ncl, c_ncl, params):
    x = x_ncl.astype(_F32)
    c = c_ncl.astype(_F32)
    eps = 1e-5
    gelu = lambda t: jax.nn.gelu(t, approximate=False)
    sig = jax.nn.sigmoid

    def conv1x1(w, b, t):                 # w: (Cout, Cin); t: (B, Cin, L)
        y = jnp.einsum("oi,bil->bol", w, t)
        return y if b is None else y + b[None, :, None]

    def bn(t, gamma, beta, mean, var):
        s = gamma / jnp.sqrt(var + eps)
        return t * s[None, :, None] + (beta - mean * s)[None, :, None]

    h = gelu(bn(x, params["bn1_gamma"], params["bn1_beta"],
                params["bn1_mean"], params["bn1_var"]))
    h = conv1x1(params["w1"], params["b1"], h)
    h = gelu(bn(h, params["bn2_gamma"], params["bn2_beta"],
                params["bn2_mean"], params["bn2_var"]))
    main = conv1x1(params["w2"], params["b2"], h)
    att = sig(conv1x1(params["wa2"], params["ba2"],
                      gelu(conv1x1(params["wa1"], params["ba1"], main))))
    main = main * att
    pooled = jnp.mean(main, axis=2, keepdims=True)
    se = sig(conv1x1(params["ws2"], params["bs2"],
                     gelu(conv1x1(params["ws1"], params["bs1"], pooled))))
    main = main * se
    cond = conv1x1(params["wc2"], params["bc2"],
                   gelu(conv1x1(params["wc1"], params["bc1"], c)))
    skip = conv1x1(params["w_sc"], None, x) if "w_sc" in params else x
    return (skip + main + cond) * params["output_scale"][0]


if __name__ == "__main__":
    configs = [
        # (B,  L,  c_dim, size_in, size_h, size_out)
        (2, 128, 8, 16, 32, 32),   # shortcut conv; TB=2, lane-dense L
        (4, 128, 8, 32, 64, 32),   # identity skip; TB=4
        (16, 100, 8, 16, 32, 32),  # TB=8, grid=2, ragged L (padding + masked mean)
    ]
    key = jax.random.PRNGKey(0)
    for B, L, c_dim, size_in, size_h, size_out in configs:
        key, kx, kc, kp = jax.random.split(key, 4)
        x = jax.random.normal(kx, (B, size_in, L), _F32)   # NCL, like PyTorch
        c = jax.random.normal(kc, (B, c_dim, L), _F32)
        params = init_params(kp, c_dim, size_in, size_h, size_out)

        out = jax.block_until_ready(enhanced_forward(x, c, params))
        ref = jax.block_until_ready(reference(x, c, params))

        assert out.shape == (B, size_out, L)
        # bf16 MXU operands + bf16 output + tanh-GELU -> loosened tolerance
        np.testing.assert_allclose(
            np.asarray(jnp.asarray(out, _F32)), np.asarray(ref),
            rtol=5e-2, atol=5e-2)
    print("KERNEL_OK")
</pallas_src>

<mosaic_0001>
module attributes {stable_mosaic.version = 11 : i64} {
  func.func @_enhanced_kernel(%arg0: i32, %arg1: memref<2x16x128xf32, #tpu.memory_space<vmem>>, %arg2: memref<2x8x128xf32, #tpu.memory_space<vmem>>, %arg3: memref<16x1xf32, #tpu.memory_space<vmem>>, %arg4: memref<16x1xf32, #tpu.memory_space<vmem>>, %arg5: memref<32x16xbf16, #tpu.memory_space<vmem>>, %arg6: memref<32x1xf32, #tpu.memory_space<vmem>>, %arg7: memref<32x32xbf16, #tpu.memory_space<vmem>>, %arg8: memref<32x1xf32, #tpu.memory_space<vmem>>, %arg9: memref<8x32xbf16, #tpu.memory_space<vmem>>, %arg10: memref<8x1xf32, #tpu.memory_space<vmem>>, %arg11: memref<32x8xbf16, #tpu.memory_space<vmem>>, %arg12: memref<32x1xf32, #tpu.memory_space<vmem>>, %arg13: memref<4x32xbf16, #tpu.memory_space<vmem>>, %arg14: memref<4x1xf32, #tpu.memory_space<vmem>>, %arg15: memref<32x4xbf16, #tpu.memory_space<vmem>>, %arg16: memref<32x1xf32, #tpu.memory_space<vmem>>, %arg17: memref<4x8xbf16, #tpu.memory_space<vmem>>, %arg18: memref<4x1xf32, #tpu.memory_space<vmem>>, %arg19: memref<32x4xbf16, #tpu.memory_space<vmem>>, %arg20: memref<32x1xf32, #tpu.memory_space<vmem>>, %arg21: memref<32x16xbf16, #tpu.memory_space<vmem>>, %arg22: memref<1x1xf32, #tpu.memory_space<vmem>>, %arg23: memref<2x32x128xbf16, #tpu.memory_space<vmem>>) attributes {dimension_semantics = [#tpu.dimension_semantics<parallel>], iteration_bounds = array<i64: 1>, scalar_prefetch = 0 : i64, scratch_operands = 0 : i64, tpu.core_type = #tpu.core_type<tc>, window_params = [{transform_indices = @transform_0, window_bounds = array<i64: 2, 16, 128>}, {transform_indices = @transform_1, window_bounds = array<i64: 2, 8, 128>}, {pipeline_mode = #tpu.pipeline_mode<synchronous>, transform_indices = @transform_2, window_bounds = array<i64: 16, 1>}, {pipeline_mode = #tpu.pipeline_mode<synchronous>, transform_indices = @transform_3, window_bounds = array<i64: 16, 1>}, {pipeline_mode = #tpu.pipeline_mode<synchronous>, transform_indices = @transform_4, window_bounds = array<i64: 32, 16>}, {pipeline_mode = #tpu.pipeline_mode<synchronous>, transform_indices = @transform_5, window_bounds = array<i64: 32, 1>}, {pipeline_mode = #tpu.pipeline_mode<synchronous>, transform_indices = @transform_6, window_bounds = array<i64: 32, 32>}, {pipeline_mode = #tpu.pipeline_mode<synchronous>, transform_indices = @transform_7, window_bounds = array<i64: 32, 1>}, {pipeline_mode = #tpu.pipeline_mode<synchronous>, transform_indices = @transform_8, window_bounds = array<i64: 8, 32>}, {pipeline_mode = #tpu.pipeline_mode<synchronous>, transform_indices = @transform_9, window_bounds = array<i64: 8, 1>}, {pipeline_mode = #tpu.pipeline_mode<synchronous>, transform_indices = @transform_10, window_bounds = array<i64: 32, 8>}, {pipeline_mode = #tpu.pipeline_mode<synchronous>, transform_indices = @transform_11, window_bounds = array<i64: 32, 1>}, {pipeline_mode = #tpu.pipeline_mode<synchronous>, transform_indices = @transform_12, window_bounds = array<i64: 4, 32>}, {pipeline_mode = #tpu.pipeline_mode<synchronous>, transform_indices = @transform_13, window_bounds = array<i64: 4, 1>}, {pipeline_mode = #tpu.pipeline_mode<synchronous>, transform_indices = @transform_14, window_bounds = array<i64: 32, 4>}, {pipeline_mode = #tpu.pipeline_mode<synchronous>, transform_indices = @transform_15, window_bounds = array<i64: 32, 1>}, {pipeline_mode = #tpu.pipeline_mode<synchronous>, transform_indices = @transform_16, window_bounds = array<i64: 4, 8>}, {pipeline_mode = #tpu.pipeline_mode<synchronous>, transform_indices = @transform_17, window_bounds = array<i64: 4, 1>}, {pipeline_mode = #tpu.pipeline_mode<synchronous>, transform_indices = @transform_18, window_bounds = array<i64: 32, 4>}, {pipeline_mode = #tpu.pipeline_mode<synchronous>, transform_indices = @transform_19, window_bounds = array<i64: 32, 1>}, {pipeline_mode = #tpu.pipeline_mode<synchronous>, transform_indices = @transform_20, window_bounds = array<i64: 32, 16>}, {pipeline_mode = #tpu.pipeline_mode<synchronous>, transform_indices = @transform_21, window_bounds = array<i64: 1, 1>}, {transform_indices = @transform_22, window_bounds = array<i64: 2, 32, 128>}]} {
    %c0 = arith.constant 0 : index
    %c0_0 = arith.constant 0 : index
    %0 = vector.load %arg3[%c0, %c0_0] : memref<16x1xf32, #tpu.memory_space<vmem>>, vector<16x1xf32>
    %c0_1 = arith.constant 0 : index
    %c0_2 = arith.constant 0 : index
    %1 = vector.load %arg4[%c0_1, %c0_2] : memref<16x1xf32, #tpu.memory_space<vmem>>, vector<16x1xf32>
    %c0_3 = arith.constant 0 : index
    %c0_4 = arith.constant 0 : index
    %2 = vector.load %arg5[%c0_3, %c0_4] : memref<32x16xbf16, #tpu.memory_space<vmem>>, vector<32x16xbf16>
    %c0_5 = arith.constant 0 : index
    %c0_6 = arith.constant 0 : index
    %3 = vector.load %arg6[%c0_5, %c0_6] : memref<32x1xf32, #tpu.memory_space<vmem>>, vector<32x1xf32>
    %c0_7 = arith.constant 0 : index
    %c0_8 = arith.constant 0 : index
    %4 = vector.load %arg7[%c0_7, %c0_8] : memref<32x32xbf16, #tpu.memory_space<vmem>>, vector<32x32xbf16>
    %c0_9 = arith.constant 0 : index
    %c0_10 = arith.constant 0 : index
    %5 = vector.load %arg8[%c0_9, %c0_10] : memref<32x1xf32, #tpu.memory_space<vmem>>, vector<32x1xf32>
    %c0_11 = arith.constant 0 : index
    %c0_12 = arith.constant 0 : index
    %6 = vector.load %arg9[%c0_11, %c0_12] : memref<8x32xbf16, #tpu.memory_space<vmem>>, vector<8x32xbf16>
    %c0_13 = arith.constant 0 : index
    %c0_14 = arith.constant 0 : index
    %7 = vector.load %arg10[%c0_13, %c0_14] : memref<8x1xf32, #tpu.memory_space<vmem>>, vector<8x1xf32>
    %c0_15 = arith.constant 0 : index
    %c0_16 = arith.constant 0 : index
    %8 = vector.load %arg11[%c0_15, %c0_16] : memref<32x8xbf16, #tpu.memory_space<vmem>>, vector<32x8xbf16>
    %c0_17 = arith.constant 0 : index
    %c0_18 = arith.constant 0 : index
    %9 = vector.load %arg12[%c0_17, %c0_18] : memref<32x1xf32, #tpu.memory_space<vmem>>, vector<32x1xf32>
    %c0_19 = arith.constant 0 : index
    %c0_20 = arith.constant 0 : index
    %10 = vector.load %arg13[%c0_19, %c0_20] : memref<4x32xbf16, #tpu.memory_space<vmem>>, vector<4x32xbf16>
    %c0_21 = arith.constant 0 : index
    %c0_22 = arith.constant 0 : index
    %11 = vector.load %arg14[%c0_21, %c0_22] : memref<4x1xf32, #tpu.memory_space<vmem>>, vector<4x1xf32>
    %c0_23 = arith.constant 0 : index
    %c0_24 = arith.constant 0 : index
    %12 = vector.load %arg15[%c0_23, %c0_24] : memref<32x4xbf16, #tpu.memory_space<vmem>>, vector<32x4xbf16>
    %c0_25 = arith.constant 0 : index
    %c0_26 = arith.constant 0 : index
    %13 = vector.load %arg16[%c0_25, %c0_26] : memref<32x1xf32, #tpu.memory_space<vmem>>, vector<32x1xf32>
    %c0_27 = arith.constant 0 : index
    %c0_28 = arith.constant 0 : index
    %14 = vector.load %arg17[%c0_27, %c0_28] : memref<4x8xbf16, #tpu.memory_space<vmem>>, vector<4x8xbf16>
    %c0_29 = arith.constant 0 : index
    %c0_30 = arith.constant 0 : index
    %15 = vector.load %arg18[%c0_29, %c0_30] : memref<4x1xf32, #tpu.memory_space<vmem>>, vector<4x1xf32>
    %c0_31 = arith.constant 0 : index
    %c0_32 = arith.constant 0 : index
    %16 = vector.load %arg19[%c0_31, %c0_32] : memref<32x4xbf16, #tpu.memory_space<vmem>>, vector<32x4xbf16>
    %c0_33 = arith.constant 0 : index
    %c0_34 = arith.constant 0 : index
    %17 = vector.load %arg20[%c0_33, %c0_34] : memref<32x1xf32, #tpu.memory_space<vmem>>, vector<32x1xf32>
    %c0_35 = arith.constant 0 : index
    %c0_36 = arith.constant 0 : index
    %18 = vector.load %arg21[%c0_35, %c0_36] : memref<32x16xbf16, #tpu.memory_space<vmem>>, vector<32x16xbf16>
    %c0_37 = arith.constant 0 : index
    %c0_38 = arith.constant 0 : index
    %19 = vector.load %arg22[%c0_37, %c0_38] : memref<1x1xf32, #tpu.memory_space<vmem>>, vector<1x1xf32>
    %c0_39 = arith.constant 0 : index
    %c0_40 = arith.constant 0 : index
    %c0_41 = arith.constant 0 : index
    %20 = vector.load %arg1[%c0_39, %c0_40, %c0_41] : memref<2x16x128xf32, #tpu.memory_space<vmem>>, vector<1x16x128xf32>
    %21 = vector.shape_cast %20 : vector<1x16x128xf32> to vector<16x128xf32>
    %22 = vector.broadcast %0 : vector<16x1xf32> to vector<16x128xf32>
    %23 = arith.mulf %21, %22 : vector<16x128xf32>
    %24 = vector.broadcast %1 : vector<16x1xf32> to vector<16x128xf32>
    %25 = arith.addf %23, %24 : vector<16x128xf32>
    %cst = arith.constant 5.000000e-01 : f32
    %26 = vector.broadcast %cst : f32 to vector<16x128xf32>
    %27 = arith.mulf %26, %25 : vector<16x128xf32>
    %28 = arith.mulf %25, %25 : vector<16x128xf32>
    %29 = arith.mulf %28, %25 : vector<16x128xf32>
    %cst_42 = arith.constant 4.471500e-02 : f32
    %30 = vector.broadcast %cst_42 : f32 to vector<16x128xf32>
    %31 = arith.mulf %30, %29 : vector<16x128xf32>
    %32 = arith.addf %25, %31 : vector<16x128xf32>
    %cst_43 = arith.constant 0.797884583 : f32
    %33 = vector.broadcast %cst_43 : f32 to vector<16x128xf32>
    %34 = arith.mulf %33, %32 : vector<16x128xf32>
    %35 = math.tanh %34 : vector<16x128xf32>
    %cst_44 = arith.constant 1.000000e+00 : f32
    %36 = vector.broadcast %cst_44 : f32 to vector<16x128xf32>
    %37 = arith.addf %36, %35 : vector<16x128xf32>
    %38 = arith.mulf %27, %37 : vector<16x128xf32>
    %39 = arith.truncf %38 : vector<16x128xf32> to vector<16x128xbf16>
    %cst_45 = arith.constant dense<0.000000e+00> : vector<32x128xf32>
    %40 = tpu.matmul %2, %39, %cst_45 {dimension_numbers = #tpu.dot_dimension_numbers<[1], [0], [0], [1], [0, 0, 1, 1], [], []>} : vector<32x16xbf16>, vector<16x128xbf16>, vector<32x128xf32> -> vector<32x128xf32>
    %41 = vector.broadcast %3 : vector<32x1xf32> to vector<32x128xf32>
    %42 = arith.addf %40, %41 : vector<32x128xf32>
    %cst_46 = arith.constant 5.000000e-01 : f32
    %43 = vector.broadcast %cst_46 : f32 to vector<32x128xf32>
    %44 = arith.mulf %43, %42 : vector<32x128xf32>
    %45 = arith.mulf %42, %42 : vector<32x128xf32>
    %46 = arith.mulf %45, %42 : vector<32x128xf32>
    %cst_47 = arith.constant 4.471500e-02 : f32
    %47 = vector.broadcast %cst_47 : f32 to vector<32x128xf32>
    %48 = arith.mulf %47, %46 : vector<32x128xf32>
    %49 = arith.addf %42, %48 : vector<32x128xf32>
    %cst_48 = arith.constant 0.797884583 : f32
    %50 = vector.broadcast %cst_48 : f32 to vector<32x128xf32>
    %51 = arith.mulf %50, %49 : vector<32x128xf32>
    %52 = math.tanh %51 : vector<32x128xf32>
    %cst_49 = arith.constant 1.000000e+00 : f32
    %53 = vector.broadcast %cst_49 : f32 to vector<32x128xf32>
    %54 = arith.addf %53, %52 : vector<32x128xf32>
    %55 = arith.mulf %44, %54 : vector<32x128xf32>
    %56 = arith.truncf %55 : vector<32x128xf32> to vector<32x128xbf16>
    %cst_50 = arith.constant dense<0.000000e+00> : vector<32x128xf32>
    %57 = tpu.matmul %4, %56, %cst_50 {dimension_numbers = #tpu.dot_dimension_numbers<[1], [0], [0], [1], [0, 0, 1, 1], [], []>} : vector<32x32xbf16>, vector<32x128xbf16>, vector<32x128xf32> -> vector<32x128xf32>
    %58 = vector.broadcast %5 : vector<32x1xf32> to vector<32x128xf32>
    %59 = arith.addf %57, %58 : vector<32x128xf32>
    %60 = arith.truncf %59 : vector<32x128xf32> to vector<32x128xbf16>
    %cst_51 = arith.constant dense<0.000000e+00> : vector<8x128xf32>
    %61 = tpu.matmul %6, %60, %cst_51 {dimension_numbers = #tpu.dot_dimension_numbers<[1], [0], [0], [1], [0, 0, 1, 1], [], []>} : vector<8x32xbf16>, vector<32x128xbf16>, vector<8x128xf32> -> vector<8x128xf32>
    %62 = vector.broadcast %7 : vector<8x1xf32> to vector<8x128xf32>
    %63 = arith.addf %61, %62 : vector<8x128xf32>
    %cst_52 = arith.constant 5.000000e-01 : f32
    %64 = vector.broadcast %cst_52 : f32 to vector<8x128xf32>
    %65 = arith.mulf %64, %63 : vector<8x128xf32>
    %66 = arith.mulf %63, %63 : vector<8x128xf32>
    %67 = arith.mulf %66, %63 : vector<8x128xf32>
    %cst_53 = arith.constant 4.471500e-02 : f32
    %68 = vector.broadcast %cst_53 : f32 to vector<8x128xf32>
    %69 = arith.mulf %68, %67 : vector<8x128xf32>
    %70 = arith.addf %63, %69 : vector<8x128xf32>
    %cst_54 = arith.constant 0.797884583 : f32
    %71 = vector.broadcast %cst_54 : f32 to vector<8x128xf32>
    %72 = arith.mulf %71, %70 : vector<8x128xf32>
    %73 = math.tanh %72 : vector<8x128xf32>
    %cst_55 = arith.constant 1.000000e+00 : f32
    %74 = vector.broadcast %cst_55 : f32 to vector<8x128xf32>
    %75 = arith.addf %74, %73 : vector<8x128xf32>
    %76 = arith.mulf %65, %75 : vector<8x128xf32>
    %77 = arith.truncf %76 : vector<8x128xf32> to vector<8x128xbf16>
    %cst_56 = arith.constant dense<0.000000e+00> : vector<32x128xf32>
    %78 = tpu.matmul %8, %77, %cst_56 {dimension_numbers = #tpu.dot_dimension_numbers<[1], [0], [0], [1], [0, 0, 1, 1], [], []>} : vector<32x8xbf16>, vector<8x128xbf16>, vector<32x128xf32> -> vector<32x128xf32>
    %79 = vector.broadcast %9 : vector<32x1xf32> to vector<32x128xf32>
    %80 = arith.addf %78, %79 : vector<32x128xf32>
    %cst_57 = arith.constant 0.000000e+00 : f32
    %81 = vector.broadcast %cst_57 : f32 to vector<32x128xf32>
    %82 = arith.subf %81, %80 : vector<32x128xf32>
    %83 = math.exp %82 : vector<32x128xf32>
    %cst_58 = arith.constant 1.000000e+00 : f32
    %84 = vector.broadcast %cst_58 : f32 to vector<32x128xf32>
    %85 = arith.addf %84, %83 : vector<32x128xf32>
    %86 = tpu.reciprocal %85 {approx = true} : vector<32x128xf32> -> vector<32x128xf32>
    %87 = arith.mulf %59, %86 : vector<32x128xf32>
    %cst_59 = arith.constant dense<0.000000e+00> : vector<32xf32>
    %88 = vector.multi_reduction <add>, %87, %cst_59 [1] : vector<32x128xf32> to vector<32xf32>
    %89 = vector.shape_cast %88 : vector<32xf32> to vector<32x1xf32>
    %cst_60 = arith.constant 7.812500e-03 : f32
    %90 = vector.broadcast %cst_60 : f32 to vector<32x1xf32>
    %91 = arith.mulf %89, %90 : vector<32x1xf32>
    %c1 = arith.constant 1 : index
    %c0_61 = arith.constant 0 : index
    %c0_62 = arith.constant 0 : index
    %92 = vector.load %arg1[%c1, %c0_61, %c0_62] : memref<2x16x128xf32, #tpu.memory_space<vmem>>, vector<1x16x128xf32>
    %93 = vector.shape_cast %92 : vector<1x16x128xf32> to vector<16x128xf32>
    %94 = vector.broadcast %0 : vector<16x1xf32> to vector<16x128xf32>
    %95 = arith.mulf %93, %94 : vector<16x128xf32>
    %96 = vector.broadcast %1 : vector<16x1xf32> to vector<16x128xf32>
    %97 = arith.addf %95, %96 : vector<16x128xf32>
    %cst_63 = arith.constant 5.000000e-01 : f32
    %98 = vector.broadcast %cst_63 : f32 to vector<16x128xf32>
    %99 = arith.mulf %98, %97 : vector<16x128xf32>
    %100 = arith.mulf %97, %97 : vector<16x128xf32>
    %101 = arith.mulf %100, %97 : vector<16x128xf32>
    %cst_64 = arith.constant 4.471500e-02 : f32
    %102 = vector.broadcast %cst_64 : f32 to vector<16x128xf32>
    %103 = arith.mulf %102, %101 : vector<16x128xf32>
    %104 = arith.addf %97, %103 : vector<16x128xf32>
    %cst_65 = arith.constant 0.797884583 : f32
    %105 = vector.broadcast %cst_65 : f32 to vector<16x128xf32>
    %106 = arith.mulf %105, %104 : vector<16x128xf32>
    %107 = math.tanh %106 : vector<16x128xf32>
    %cst_66 = arith.constant 1.000000e+00 : f32
    %108 = vector.broadcast %cst_66 : f32 to vector<16x128xf32>
    %109 = arith.addf %108, %107 : vector<16x128xf32>
    %110 = arith.mulf %99, %109 : vector<16x128xf32>
    %111 = arith.truncf %110 : vector<16x128xf32> to vector<16x128xbf16>
    %cst_67 = arith.constant dense<0.000000e+00> : vector<32x128xf32>
    %112 = tpu.matmul %2, %111, %cst_67 {dimension_numbers = #tpu.dot_dimension_numbers<[1], [0], [0], [1], [0, 0, 1, 1], [], []>} : vector<32x16xbf16>, vector<16x128xbf16>, vector<32x128xf32> -> vector<32x128xf32>
    %113 = vector.broadcast %3 : vector<32x1xf32> to vector<32x128xf32>
    %114 = arith.addf %112, %113 : vector<32x128xf32>
    %cst_68 = arith.constant 5.000000e-01 : f32
    %115 = vector.broadcast %cst_68 : f32 to vector<32x128xf32>
    %116 = arith.mulf %115, %114 : vector<32x128xf32>
    %117 = arith.mulf %114, %114 : vector<32x128xf32>
    %118 = arith.mulf %117, %114 : vector<32x128xf32>
    %cst_69 = arith.constant 4.471500e-02 : f32
    %119 = vector.broadcast %cst_69 : f32 to vector<32x128xf32>
    %120 = arith.mulf %119, %118 : vector<32x128xf32>
    %121 = arith.addf %114, %120 : vector<32x128xf32>
    %cst_70 = arith.constant 0.797884583 : f32
    %122 = vector.broadcast %cst_70 : f32 to vector<32x128xf32>
    %123 = arith.mulf %122, %121 : vector<32x128xf32>
    %124 = math.tanh %123 : vector<32x128xf32>
    %cst_71 = arith.constant 1.000000e+00 : f32
    %125 = vector.broadcast %cst_71 : f32 to vector<32x128xf32>
    %126 = arith.addf %125, %124 : vector<32x128xf32>
    %127 = arith.mulf %116, %126 : vector<32x128xf32>
    %128 = arith.truncf %127 : vector<32x128xf32> to vector<32x128xbf16>
    %cst_72 = arith.constant dense<0.000000e+00> : vector<32x128xf32>
    %129 = tpu.matmul %4, %128, %cst_72 {dimension_numbers = #tpu.dot_dimension_numbers<[1], [0], [0], [1], [0, 0, 1, 1], [], []>} : vector<32x32xbf16>, vector<32x128xbf16>, vector<32x128xf32> -> vector<32x128xf32>
    %130 = vector.broadcast %5 : vector<32x1xf32> to vector<32x128xf32>
    %131 = arith.addf %129, %130 : vector<32x128xf32>
    %132 = arith.truncf %131 : vector<32x128xf32> to vector<32x128xbf16>
    %cst_73 = arith.constant dense<0.000000e+00> : vector<8x128xf32>
    %133 = tpu.matmul %6, %132, %cst_73 {dimension_numbers = #tpu.dot_dimension_numbers<[1], [0], [0], [1], [0, 0, 1, 1], [], []>} : vector<8x32xbf16>, vector<32x128xbf16>, vector<8x128xf32> -> vector<8x128xf32>
    %134 = vector.broadcast %7 : vector<8x1xf32> to vector<8x128xf32>
    %135 = arith.addf %133, %134 : vector<8x128xf32>
    %cst_74 = arith.constant 5.000000e-01 : f32
    %136 = vector.broadcast %cst_74 : f32 to vector<8x128xf32>
    %137 = arith.mulf %136, %135 : vector<8x128xf32>
    %138 = arith.mulf %135, %135 : vector<8x128xf32>
    %139 = arith.mulf %138, %135 : vector<8x128xf32>
    %cst_75 = arith.constant 4.471500e-02 : f32
    %140 = vector.broadcast %cst_75 : f32 to vector<8x128xf32>
    %141 = arith.mulf %140, %139 : vector<8x128xf32>
    %142 = arith.addf %135, %141 : vector<8x128xf32>
    %cst_76 = arith.constant 0.797884583 : f32
    %143 = vector.broadcast %cst_76 : f32 to vector<8x128xf32>
    %144 = arith.mulf %143, %142 : vector<8x128xf32>
    %145 = math.tanh %144 : vector<8x128xf32>
    %cst_77 = arith.constant 1.000000e+00 : f32
    %146 = vector.broadcast %cst_77 : f32 to vector<8x128xf32>
    %147 = arith.addf %146, %145 : vector<8x128xf32>
    %148 = arith.mulf %137, %147 : vector<8x128xf32>
    %149 = arith.truncf %148 : vector<8x128xf32> to vector<8x128xbf16>
    %cst_78 = arith.constant dense<0.000000e+00> : vector<32x128xf32>
    %150 = tpu.matmul %8, %149, %cst_78 {dimension_numbers = #tpu.dot_dimension_numbers<[1], [0], [0], [1], [0, 0, 1, 1], [], []>} : vector<32x8xbf16>, vector<8x128xbf16>, vector<32x128xf32> -> vector<32x128xf32>
    %151 = vector.broadcast %9 : vector<32x1xf32> to vector<32x128xf32>
    %152 = arith.addf %150, %151 : vector<32x128xf32>
    %cst_79 = arith.constant 0.000000e+00 : f32
    %153 = vector.broadcast %cst_79 : f32 to vector<32x128xf32>
    %154 = arith.subf %153, %152 : vector<32x128xf32>
    %155 = math.exp %154 : vector<32x128xf32>
    %cst_80 = arith.constant 1.000000e+00 : f32
    %156 = vector.broadcast %cst_80 : f32 to vector<32x128xf32>
    %157 = arith.addf %156, %155 : vector<32x128xf32>
    %158 = tpu.reciprocal %157 {approx = true} : vector<32x128xf32> -> vector<32x128xf32>
    %159 = arith.mulf %131, %158 : vector<32x128xf32>
    %cst_81 = arith.constant dense<0.000000e+00> : vector<32xf32>
    %160 = vector.multi_reduction <add>, %159, %cst_81 [1] : vector<32x128xf32> to vector<32xf32>
    %161 = vector.shape_cast %160 : vector<32xf32> to vector<32x1xf32>
    %cst_82 = arith.constant 7.812500e-03 : f32
    %162 = vector.broadcast %cst_82 : f32 to vector<32x1xf32>
    %163 = arith.mulf %161, %162 : vector<32x1xf32>
    %164 = tpu.concatenate %91, %163 in 1 : vector<32x1xf32>, vector<32x1xf32> -> vector<32x2xf32>
    %165 = arith.truncf %164 : vector<32x2xf32> to vector<32x2xbf16>
    %cst_83 = arith.constant dense<0.000000e+00> : vector<4x2xf32>
    %166 = tpu.matmul %10, %165, %cst_83 {dimension_numbers = #tpu.dot_dimension_numbers<[1], [0], [0], [1], [0, 0, 1, 1], [], []>} : vector<4x32xbf16>, vector<32x2xbf16>, vector<4x2xf32> -> vector<4x2xf32>
    %167 = vector.broadcast %11 : vector<4x1xf32> to vector<4x2xf32>
    %168 = arith.addf %166, %167 : vector<4x2xf32>
    %cst_84 = arith.constant 5.000000e-01 : f32
    %169 = vector.broadcast %cst_84 : f32 to vector<4x2xf32>
    %170 = arith.mulf %169, %168 : vector<4x2xf32>
    %171 = arith.mulf %168, %168 : vector<4x2xf32>
    %172 = arith.mulf %171, %168 : vector<4x2xf32>
    %cst_85 = arith.constant 4.471500e-02 : f32
    %173 = vector.broadcast %cst_85 : f32 to vector<4x2xf32>
    %174 = arith.mulf %173, %172 : vector<4x2xf32>
    %175 = arith.addf %168, %174 : vector<4x2xf32>
    %cst_86 = arith.constant 0.797884583 : f32
    %176 = vector.broadcast %cst_86 : f32 to vector<4x2xf32>
    %177 = arith.mulf %176, %175 : vector<4x2xf32>
    %178 = math.tanh %177 : vector<4x2xf32>
    %cst_87 = arith.constant 1.000000e+00 : f32
    %179 = vector.broadcast %cst_87 : f32 to vector<4x2xf32>
    %180 = arith.addf %179, %178 : vector<4x2xf32>
    %181 = arith.mulf %170, %180 : vector<4x2xf32>
    %182 = arith.truncf %181 : vector<4x2xf32> to vector<4x2xbf16>
    %cst_88 = arith.constant dense<0.000000e+00> : vector<32x2xf32>
    %183 = tpu.matmul %12, %182, %cst_88 {dimension_numbers = #tpu.dot_dimension_numbers<[1], [0], [0], [1], [0, 0, 1, 1], [], []>} : vector<32x4xbf16>, vector<4x2xbf16>, vector<32x2xf32> -> vector<32x2xf32>
    %184 = vector.broadcast %13 : vector<32x1xf32> to vector<32x2xf32>
    %185 = arith.addf %183, %184 : vector<32x2xf32>
    %cst_89 = arith.constant 0.000000e+00 : f32
    %186 = vector.broadcast %cst_89 : f32 to vector<32x2xf32>
    %187 = arith.subf %186, %185 : vector<32x2xf32>
    %188 = math.exp %187 : vector<32x2xf32>
    %cst_90 = arith.constant 1.000000e+00 : f32
    %189 = vector.broadcast %cst_90 : f32 to vector<32x2xf32>
    %190 = arith.addf %189, %188 : vector<32x2xf32>
    %191 = tpu.reciprocal %190 {approx = true} : vector<32x2xf32> -> vector<32x2xf32>
    %c0_91 = arith.constant 0 : index
    %c0_92 = arith.constant 0 : index
    %c0_93 = arith.constant 0 : index
    %192 = vector.load %arg2[%c0_91, %c0_92, %c0_93] : memref<2x8x128xf32, #tpu.memory_space<vmem>>, vector<1x8x128xf32>
    %193 = vector.shape_cast %192 : vector<1x8x128xf32> to vector<8x128xf32>
    %194 = arith.truncf %193 : vector<8x128xf32> to vector<8x128xbf16>
    %cst_94 = arith.constant dense<0.000000e+00> : vector<4x128xf32>
    %195 = tpu.matmul %14, %194, %cst_94 {dimension_numbers = #tpu.dot_dimension_numbers<[1], [0], [0], [1], [0, 0, 1, 1], [], []>} : vector<4x8xbf16>, vector<8x128xbf16>, vector<4x128xf32> -> vector<4x128xf32>
    %196 = vector.broadcast %15 : vector<4x1xf32> to vector<4x128xf32>
    %197 = arith.addf %195, %196 : vector<4x128xf32>
    %cst_95 = arith.constant 5.000000e-01 : f32
    %198 = vector.broadcast %cst_95 : f32 to vector<4x128xf32>
    %199 = arith.mulf %198, %197 : vector<4x128xf32>
    %200 = arith.mulf %197, %197 : vector<4x128xf32>
    %201 = arith.mulf %200, %197 : vector<4x128xf32>
    %cst_96 = arith.constant 4.471500e-02 : f32
    %202 = vector.broadcast %cst_96 : f32 to vector<4x128xf32>
    %203 = arith.mulf %202, %201 : vector<4x128xf32>
    %204 = arith.addf %197, %203 : vector<4x128xf32>
    %cst_97 = arith.constant 0.797884583 : f32
    %205 = vector.broadcast %cst_97 : f32 to vector<4x128xf32>
    %206 = arith.mulf %205, %204 : vector<4x128xf32>
    %207 = math.tanh %206 : vector<4x128xf32>
    %cst_98 = arith.constant 1.000000e+00 : f32
    %208 = vector.broadcast %cst_98 : f32 to vector<4x128xf32>
    %209 = arith.addf %208, %207 : vector<4x128xf32>
    %210 = arith.mulf %199, %209 : vector<4x128xf32>
    %211 = arith.truncf %210 : vector<4x128xf32> to vector<4x128xbf16>
    %cst_99 = arith.constant dense<0.000000e+00> : vector<32x128xf32>
    %212 = tpu.matmul %16, %211, %cst_99 {dimension_numbers = #tpu.dot_dimension_numbers<[1], [0], [0], [1], [0, 0, 1, 1], [], []>} : vector<32x4xbf16>, vector<4x128xbf16>, vector<32x128xf32> -> vector<32x128xf32>
    %213 = vector.broadcast %17 : vector<32x1xf32> to vector<32x128xf32>
    %214 = arith.addf %212, %213 : vector<32x128xf32>
    %c0_100 = arith.constant 0 : index
    %c0_101 = arith.constant 0 : index
    %c0_102 = arith.constant 0 : index
    %215 = vector.load %arg1[%c0_100, %c0_101, %c0_102] : memref<2x16x128xf32, #tpu.memory_space<vmem>>, vector<1x16x128xf32>
    %216 = vector.shape_cast %215 : vector<1x16x128xf32> to vector<16x128xf32>
    %217 = arith.truncf %216 : vector<16x128xf32> to vector<16x128xbf16>
    %cst_103 = arith.constant dense<0.000000e+00> : vector<32x128xf32>
    %218 = tpu.matmul %18, %217, %cst_103 {dimension_numbers = #tpu.dot_dimension_numbers<[1], [0], [0], [1], [0, 0, 1, 1], [], []>} : vector<32x16xbf16>, vector<16x128xbf16>, vector<32x128xf32> -> vector<32x128xf32>
    %219 = vector.extract_strided_slice %191 {offsets = [0, 0], sizes = [32, 1], strides = [1, 1]} : vector<32x2xf32> to vector<32x1xf32>
    %220 = vector.broadcast %219 : vector<32x1xf32> to vector<32x128xf32>
    %221 = arith.mulf %87, %220 : vector<32x128xf32>
    %222 = arith.addf %218, %221 : vector<32x128xf32>
    %223 = arith.addf %222, %214 : vector<32x128xf32>
    %224 = vector.broadcast %19 : vector<1x1xf32> to vector<32x128xf32>
    %225 = arith.mulf %223, %224 : vector<32x128xf32>
    %226 = arith.truncf %225 : vector<32x128xf32> to vector<32x128xbf16>
    %c0_104 = arith.constant 0 : index
    %c0_105 = arith.constant 0 : index
    %c0_106 = arith.constant 0 : index
    %227 = vector.load %arg23[%c0_104, %c0_105, %c0_106] : memref<2x32x128xbf16, #tpu.memory_space<vmem>>, vector<1x32x128xbf16>
    %228 = vector.shape_cast %227 : vector<1x32x128xbf16> to vector<32x128xbf16>
    %229 = vector.shape_cast %226 : vector<32x128xbf16> to vector<1x32x128xbf16>
    tpu.vector_store %arg23[%c0_104, %c0_105, %c0_106], %229 {strides = array<i32>} : memref<2x32x128xbf16, #tpu.memory_space<vmem>>, vector<1x32x128xbf16>,
    %c1_107 = arith.constant 1 : index
    %c0_108 = arith.constant 0 : index
    %c0_109 = arith.constant 0 : index
    %230 = vector.load %arg2[%c1_107, %c0_108, %c0_109] : memref<2x8x128xf32, #tpu.memory_space<vmem>>, vector<1x8x128xf32>
    %231 = vector.shape_cast %230 : vector<1x8x128xf32> to vector<8x128xf32>
    %232 = arith.truncf %231 : vector<8x128xf32> to vector<8x128xbf16>
    %cst_110 = arith.constant dense<0.000000e+00> : vector<4x128xf32>
    %233 = tpu.matmul %14, %232, %cst_110 {dimension_numbers = #tpu.dot_dimension_numbers<[1], [0], [0], [1], [0, 0, 1, 1], [], []>} : vector<4x8xbf16>, vector<8x128xbf16>, vector<4x128xf32> -> vector<4x128xf32>
    %234 = vector.broadcast %15 : vector<4x1xf32> to vector<4x128xf32>
    %235 = arith.addf %233, %234 : vector<4x128xf32>
    %cst_111 = arith.constant 5.000000e-01 : f32
    %236 = vector.broadcast %cst_111 : f32 to vector<4x128xf32>
    %237 = arith.mulf %236, %235 : vector<4x128xf32>
    %238 = arith.mulf %235, %235 : vector<4x128xf32>
    %239 = arith.mulf %238, %235 : vector<4x128xf32>
    %cst_112 = arith.constant 4.471500e-02 : f32
    %240 = vector.broadcast %cst_112 : f32 to vector<4x128xf32>
    %241 = arith.mulf %240, %239 : vector<4x128xf32>
    %242 = arith.addf %235, %241 : vector<4x128xf32>
    %cst_113 = arith.constant 0.797884583 : f32
    %243 = vector.broadcast %cst_113 : f32 to vector<4x128xf32>
    %244 = arith.mulf %243, %242 : vector<4x128xf32>
    %245 = math.tanh %244 : vector<4x128xf32>
    %cst_114 = arith.constant 1.000000e+00 : f32
    %246 = vector.broadcast %cst_114 : f32 to vector<4x128xf32>
    %247 = arith.addf %246, %245 : vector<4x128xf32>
    %248 = arith.mulf %237, %247 : vector<4x128xf32>
    %249 = arith.truncf %248 : vector<4x128xf32> to vector<4x128xbf16>
    %cst_115 = arith.constant dense<0.000000e+00> : vector<32x128xf32>
    %250 = tpu.matmul %16, %249, %cst_115 {dimension_numbers = #tpu.dot_dimension_numbers<[1], [0], [0], [1], [0, 0, 1, 1], [], []>} : vector<32x4xbf16>, vector<4x128xbf16>, vector<32x128xf32> -> vector<32x128xf32>
    %251 = vector.broadcast %17 : vector<32x1xf32> to vector<32x128xf32>
    %252 = arith.addf %250, %251 : vector<32x128xf32>
    %c1_116 = arith.constant 1 : index
    %c0_117 = arith.constant 0 : index
    %c0_118 = arith.constant 0 : index
    %253 = vector.load %arg1[%c1_116, %c0_117, %c0_118] : memref<2x16x128xf32, #tpu.memory_space<vmem>>, vector<1x16x128xf32>
    %254 = vector.shape_cast %253 : vector<1x16x128xf32> to vector<16x128xf32>
    %255 = arith.truncf %254 : vector<16x128xf32> to vector<16x128xbf16>
    %cst_119 = arith.constant dense<0.000000e+00> : vector<32x128xf32>
    %256 = tpu.matmul %18, %255, %cst_119 {dimension_numbers = #tpu.dot_dimension_numbers<[1], [0], [0], [1], [0, 0, 1, 1], [], []>} : vector<32x16xbf16>, vector<16x128xbf16>, vector<32x128xf32> -> vector<32x128xf32>
    %257 = vector.extract_strided_slice %191 {offsets = [0, 1], sizes = [32, 1], strides = [1, 1]} : vector<32x2xf32> to vector<32x1xf32>
    %258 = vector.broadcast %257 : vector<32x1xf32> to vector<32x128xf32>
    %259 = arith.mulf %159, %258 : vector<32x128xf32>
    %260 = arith.addf %256, %259 : vector<32x128xf32>
    %261 = arith.addf %260, %252 : vector<32x128xf32>
    %262 = vector.broadcast %19 : vector<1x1xf32> to vector<32x128xf32>
    %263 = arith.mulf %261, %262 : vector<32x128xf32>
    %264 = arith.truncf %263 : vector<32x128xf32> to vector<32x128xbf16>
    %c1_120 = arith.constant 1 : index
    %c0_121 = arith.constant 0 : index
    %c0_122 = arith.constant 0 : index
    %265 = vector.load %arg23[%c1_120, %c0_121, %c0_122] : memref<2x32x128xbf16, #tpu.memory_space<vmem>>, vector<1x32x128xbf16>
    %266 = vector.shape_cast %265 : vector<1x32x128xbf16> to vector<32x128xbf16>
    %267 = vector.shape_cast %264 : vector<32x128xbf16> to vector<1x32x128xbf16>
    tpu.vector_store %arg23[%c1_120, %c0_121, %c0_122], %267 {strides = array<i32>} : memref<2x32x128xbf16, #tpu.memory_space<vmem>>, vector<1x32x128xbf16>,
    return
  }
  func.func @transform_0(%arg0: i32) -> (i32, i32, i32) {
    %c0_i32 = arith.constant 0 : i32
    %c0_i32_0 = arith.constant 0 : i32
    %c0_i32_1 = arith.constant 0 : i32
    return %arg0, %c0_i32, %c0_i32_0 : i32, i32, i32
  }
  func.func @transform_1(%arg0: i32) -> (i32, i32, i32) {
    %c0_i32 = arith.constant 0 : i32
    %c0_i32_0 = arith.constant 0 : i32
    %c0_i32_1 = arith.constant 0 : i32
    return %arg0, %c0_i32, %c0_i32_0 : i32, i32, i32
  }
  func.func @transform_2(%arg0: i32) -> (i32, i32) {
    %c0_i32 = arith.constant 0 : i32
    %c0_i32_0 = arith.constant 0 : i32
    %c0_i32_1 = arith.constant 0 : i32
    return %c0_i32, %c0_i32_0 : i32, i32
  }
  func.func @transform_3(%arg0: i32) -> (i32, i32) {
    %c0_i32 = arith.constant 0 : i32
    %c0_i32_0 = arith.constant 0 : i32
    %c0_i32_1 = arith.constant 0 : i32
    return %c0_i32, %c0_i32_0 : i32, i32
  }
  func.func @transform_4(%arg0: i32) -> (i32, i32) {
    %c0_i32 = arith.constant 0 : i32
    %c0_i32_0 = arith.constant 0 : i32
    %c0_i32_1 = arith.constant 0 : i32
    return %c0_i32, %c0_i32_0 : i32, i32
  }
  func.func @transform_5(%arg0: i32) -> (i32, i32) {
    %c0_i32 = arith.constant 0 : i32
    %c0_i32_0 = arith.constant 0 : i32
    %c0_i32_1 = arith.constant 0 : i32
    return %c0_i32, %c0_i32_0 : i32, i32
  }
  func.func @transform_6(%arg0: i32) -> (i32, i32) {
    %c0_i32 = arith.constant 0 : i32
    %c0_i32_0 = arith.constant 0 : i32
    %c0_i32_1 = arith.constant 0 : i32
    return %c0_i32, %c0_i32_0 : i32, i32
  }
  func.func @transform_7(%arg0: i32) -> (i32, i32) {
    %c0_i32 = arith.constant 0 : i32
    %c0_i32_0 = arith.constant 0 : i32
    %c0_i32_1 = arith.constant 0 : i32
    return %c0_i32, %c0_i32_0 : i32, i32
  }
  func.func @transform_8(%arg0: i32) -> (i32, i32) {
    %c0_i32 = arith.constant 0 : i32
    %c0_i32_0 = arith.constant 0 : i32
    %c0_i32_1 = arith.constant 0 : i32
    return %c0_i32, %c0_i32_0 : i32, i32
  }
  func.func @transform_9(%arg0: i32) -> (i32, i32) {
    %c0_i32 = arith.constant 0 : i32
    %c0_i32_0 = arith.constant 0 : i32
    %c0_i32_1 = arith.constant 0 : i32
    return %c0_i32, %c0_i32_0 : i32, i32
  }
  func.func @transform_10(%arg0: i32) -> (i32, i32) {
    %c0_i32 = arith.constant 0 : i32
    %c0_i32_0 = arith.constant 0 : i32
    %c0_i32_1 = arith.constant 0 : i32
    return %c0_i32, %c0_i32_0 : i32, i32
  }
  func.func @transform_11(%arg0: i32) -> (i32, i32) {
    %c0_i32 = arith.constant 0 : i32
    %c0_i32_0 = arith.constant 0 : i32
    %c0_i32_1 = arith.constant 0 : i32
    return %c0_i32, %c0_i32_0 : i32, i32
  }
  func.func @transform_12(%arg0: i32) -> (i32, i32) {
    %c0_i32 = arith.constant 0 : i32
    %c0_i32_0 = arith.constant 0 : i32
    %c0_i32_1 = arith.constant 0 : i32
    return %c0_i32, %c0_i32_0 : i32, i32
  }
  func.func @transform_13(%arg0: i32) -> (i32, i32) {
    %c0_i32 = arith.constant 0 : i32
    %c0_i32_0 = arith.constant 0 : i32
    %c0_i32_1 = arith.constant 0 : i32
    return %c0_i32, %c0_i32_0 : i32, i32
  }
  func.func @transform_14(%arg0: i32) -> (i32, i32) {
    %c0_i32 = arith.constant 0 : i32
    %c0_i32_0 = arith.constant 0 : i32
    %c0_i32_1 = arith.constant 0 : i32
    return %c0_i32, %c0_i32_0 : i32, i32
  }
  func.func @transform_15(%arg0: i32) -> (i32, i32) {
    %c0_i32 = arith.constant 0 : i32
    %c0_i32_0 = arith.constant 0 : i32
    %c0_i32_1 = arith.constant 0 : i32
    return %c0_i32, %c0_i32_0 : i32, i32
  }
  func.func @transform_16(%arg0: i32) -> (i32, i32) {
    %c0_i32 = arith.constant 0 : i32
    %c0_i32_0 = arith.constant 0 : i32
    %c0_i32_1 = arith.constant 0 : i32
    return %c0_i32, %c0_i32_0 : i32, i32
  }
  func.func @transform_17(%arg0: i32) -> (i32, i32) {
    %c0_i32 = arith.constant 0 : i32
    %c0_i32_0 = arith.constant 0 : i32
    %c0_i32_1 = arith.constant 0 : i32
    return %c0_i32, %c0_i32_0 : i32, i32
  }
  func.func @transform_18(%arg0: i32) -> (i32, i32) {
    %c0_i32 = arith.constant 0 : i32
    %c0_i32_0 = arith.constant 0 : i32
    %c0_i32_1 = arith.constant 0 : i32
    return %c0_i32, %c0_i32_0 : i32, i32
  }
  func.func @transform_19(%arg0: i32) -> (i32, i32) {
    %c0_i32 = arith.constant 0 : i32
    %c0_i32_0 = arith.constant 0 : i32
    %c0_i32_1 = arith.constant 0 : i32
    return %c0_i32, %c0_i32_0 : i32, i32
  }
  func.func @transform_20(%arg0: i32) -> (i32, i32) {
    %c0_i32 = arith.constant 0 : i32
    %c0_i32_0 = arith.constant 0 : i32
    %c0_i32_1 = arith.constant 0 : i32
    return %c0_i32, %c0_i32_0 : i32, i32
  }
  func.func @transform_21(%arg0: i32) -> (i32, i32) {
    %c0_i32 = arith.constant 0 : i32
    %c0_i32_0 = arith.constant 0 : i32
    %c0_i32_1 = arith.constant 0 : i32
    return %c0_i32, %c0_i32_0 : i32, i32
  }
  func.func @transform_22(%arg0: i32) -> (i32, i32, i32) {
    %c0_i32 = arith.constant 0 : i32
    %c0_i32_0 = arith.constant 0 : i32
    %c0_i32_1 = arith.constant 0 : i32
    return %arg0, %c0_i32, %c0_i32_0 : i32, i32, i32
  }
}

</mosaic_0001>

<bundles_post_ra>
// kernel: tpu_custom_call.1
= control target key start
LH: loop header
LB: loop body
LE: loop exit
PB: predicated region body
PF: predicated region fallthrough
CT: control target
= control target key end

     0   :  { %s2462_s0 = inlined_call_operand.vmem [shape: f32[2,16,128], index: 0, kind: input, shape index: {}]   ;;  %s2463_s1 = inlined_call_operand.vmem [shape: f32[2,8,128], index: 1, kind: input, shape index: {}]   ;;  %s2464_s2 = inlined_call_operand.vmem [shape: f32[16,1], index: 2, kind: input, shape index: {}]   ;;  %s2465_s3 = inlined_call_operand.vmem [shape: f32[16,1], index: 3, kind: input, shape index: {}]   ;;  %s2466_s4 = inlined_call_operand.vmem [shape: bf16[32,16], index: 4, kind: input, shape index: {}]   ;;  %s2467_s5 = inlined_call_operand.vmem [shape: f32[32,1], index: 5, kind: input, shape index: {}]   ;;  %s2468_s6 = inlined_call_operand.vmem [shape: bf16[32,32], index: 6, kind: input, shape index: {}]   ;;  %s2469_s7 = inlined_call_operand.vmem [shape: f32[32,1], index: 7, kind: input, shape index: {}]   ;;  %s2470_s8 = inlined_call_operand.vmem [shape: bf16[8,32], index: 8, kind: input, shape index: {}]   ;;  %s2471_s9 = inlined_call_operand.vmem [shape: f32[8,1], index: 9, kind: input, shape index: {}]   ;;  %s2472_s10 = inlined_call_operand.vmem [shape: bf16[32,8], index: 10, kind: input, shape index: {}]   ;;  %s2473_s11 = inlined_call_operand.vmem [shape: f32[32,1], index: 11, kind: input, shape index: {}]   ;;  %s2474_s12 = inlined_call_operand.vmem [shape: bf16[4,32], index: 12, kind: input, shape index: {}]   ;;  %s2475_s13 = inlined_call_operand.vmem [shape: f32[4,1], index: 13, kind: input, shape index: {}]   ;;  %s2476_s14 = inlined_call_operand.vmem [shape: bf16[32,4], index: 14, kind: input, shape index: {}]   ;;  %s2477_s15 = inlined_call_operand.vmem [shape: f32[32,1], index: 15, kind: input, shape index: {}]   ;;  %s2478_s16 = inlined_call_operand.vmem [shape: bf16[4,8], index: 16, kind: input, shape index: {}]   ;;  %s2479_s17 = inlined_call_operand.vmem [shape: f32[4,1], index: 17, kind: input, shape index: {}]   ;;  %s2480_s18 = inlined_call_operand.vmem [shape: bf16[32,4], index: 18, kind: input, shape index: {}]   ;;  %s2481_s19 = inlined_call_operand.vmem [shape: f32[32,1], index: 19, kind: input, shape index: {}]   ;;  %s2482_s20 = inlined_call_operand.vmem [shape: bf16[32,16], index: 20, kind: input, shape index: {}]   ;;  %s2483_s21 = inlined_call_operand.<no memory space> [shape: f32[1,1], index: 21, kind: input, shape index: {}]   ;;  %s2484_s22 = inlined_call_operand.hbm [shape: bf16[2,32,128], index: 22, kind: output, shape index: {}]  }
   0x1   :  { %2492 = sst [smem:[#allocation6_spill]] %s2462_s0  ;;  %v27_v0 = vstv %s2483_s21 }
   0x2   :  { %2493 = sst [smem:[#allocation7_spill]] %s2463_s1  ;;  %28 = vst [vmem:[#allocation2] sm:$0x1] %v27_v0 }
   0x3   :  { %2494 = sst [smem:[#allocation8_spill]] %s2464_s2 }
   0x4   :  { %2495 = sst [smem:[#allocation9_spill]] %s2465_s3 }
   0x5   :  { %2496 = sst [smem:[#allocation10_spill]] %s2466_s4 }
   0x6   :  { %2497 = sst [smem:[#allocation11_spill]] %s2467_s5 }
   0x7   :  { %2498 = sst [smem:[#allocation12_spill]] %s2468_s6 }
   0x8   :  { %s2499_s4 = sld [smem:[#allocation9_spill]]  ;;  %s2500_s1 = sld [smem:[#allocation8_spill]]  ;;  %v1951_v3 = vmov 0   ;;  %v92_v10 = vld [vmem:[%s2469_s7 + $0x8] sm:$0xff]  ;;  %v91_v11 = vld [vmem:[%s2469_s7] sm:$0xff] }
   0x9   :  { %1825 = vset.pattern.permute.xlu1 %v1951_v3  ;;  %1824 = vset.pattern.permute.xlu0 %v1951_v3  ;;  %s2501_s2 = sld [smem:[#allocation11_spill]] }
   0xe   :  { %v77_v1 = vld [vmem:[%s2499_s4] sm:$0xff]  ;;  %v78_v4 = vld [vmem:[%s2499_s4 + $0x8] sm:$0xff] }
   0xf   :  { %v75_v2 = vld [vmem:[%s2500_s1] sm:$0xff]  ;;  %146 = vperm.xlu1 %1825, %v77_v1   ;;  %v76_v5 = vld [vmem:[%s2500_s1 + $0x8] sm:$0xff]  ;;  %v86_v8 = vld [vmem:[%s2501_s2 + $0x18] sm:$0xff] }
  0x10   :  { %134 = vperm.xlu0 %1824, %v75_v2   ;;  %v84_v6 = vld [vmem:[%s2501_s2 + $0x8] sm:$0xff]  ;;  %v83_v7 = vld [vmem:[%s2501_s2] sm:$0xff]  ;;  %v85_v9 = vld [vmem:[%s2501_s2 + $0x10] sm:$0xff] }
  0x13   :  { %151 = vperm.xlu1 %1825, %v78_v4  }
  0x14   :  { %139 = vperm.xlu0 %1824, %v76_v5  }
  0x17   :  { %182 = vperm.xlu1 %1825, %v84_v6  }
  0x18   :  { %177 = vperm.xlu0 %1824, %v83_v7  }
  0x1b   :  { %192 = vperm.xlu1 %1825, %v86_v8  }
  0x1c   :  { %187 = vperm.xlu0 %1824, %v85_v9  }
  0x1d   :  { %29 = vsyncpa [#allocation4], 0  ;;  %v94_v12 = vld [vmem:[%s2469_s7 + $0x18] sm:$0xff]  ;;  %v93_v13 = vld [vmem:[%s2469_s7 + $0x10] sm:$0xff]  ;;  %vm205_vm0 = vcmask 130048   ;;  %s2503_s21 = sld [smem:[#allocation6_spill]] }
  0x1e   :  { %v101_v14 = vld [vmem:[%s2473_s11] sm:$0xff]  ;;  %v103_v16 = vld [vmem:[%s2473_s11 + $0x10] sm:$0xff]  ;;  %v102_v17 = vld [vmem:[%s2473_s11 + $0x8] sm:$0xff]  ;;  %s2504_s4 = sld [smem:[#allocation12_spill]]  ;;  %vm329_vm1 = vcmask 261120   ;;  %vm1953_vm2 = vmmov 0  }
  0x1f   :  { %306 = vperm.xlu1 %1825, %v92_v10   ;;  %v96_v15 = vld [vmem:[%s2471_s9] sm:$0xff]  ;;  %v104_v18 = vld [vmem:[%s2473_s11 + $0x18] sm:$0xff]  ;;  %s2502_s9 = sld [smem:[#allocation10_spill]]  ;;  %vm475_vm3 = vcmask 64512   ;;  %vm482_vm4 = vcmask 1043456   ;;  %vm873_vm5 = vcmask 7168  }
  0x20   :  { %301 = vperm.xlu0 %1824, %v91_v11   ;;  %s2505_s23 = sld [smem:[#allocation7_spill]]  ;;  %vm968_vm6 = vcmask 31744   ;;  %vm975_vm7 = vcmask 1041408  }
  0x23   :  { %316 = vperm.xlu1 %1825, %v94_v12   ;;  %v2139_v20 = vld [vmem:[%s2503_s21] sm:$0xff]  ;;  %v2144_v21 = vld [vmem:[%s2503_s21 + $0x10] sm:$0xff]  ;;  %v2151_v26 = vld [vmem:[%s2503_s21 + $0x8] sm:$0xff] }
  0x24   :  { %311 = vperm.xlu0 %1824, %v93_v13   ;;  %v2156_v27 = vld [vmem:[%s2503_s21 + $0x18] sm:$0xff]  ;;  %v2172_v12 = vld [vmem:[%s2504_s4] sm:$0xff]  }
  0x25   :  { %v2132_v19 = vld [vmem:[%s2502_s9] sm:$0xff]   ;;  %v2165_v11 = vld [vmem:[%s2502_s9 + $0x8] sm:$0xff]  }
  0x26   :  { %1684 = vmatprep.mubr.msk.bf16.mxu1 %vm205_vm0, %v2132_v19 }
  0x27   :  { %447 = vperm.xlu1 %1825, %v101_v14  }
  0x28   :  { %389 = vperm.xlu0 %1824, %v96_v15  }
  0x2b   :  { %457 = vperm.xlu1 %1825, %v103_v16  }
  0x2c   :  { %452 = vperm.xlu0 %1824, %v102_v17  }
  0x30   :  { %462 = vperm.xlu0 %1824, %v104_v18  }
  0x8e   :  { %v147_v22 = vpop.permute.xlu1 %146 }
  0x8f   :  { %v135_v23 = vpop.permute.xlu0 %134 }
  0x90   :  { %v142_v24 = vmul.f32 %v135_v23, %v2139_v20  ;;  %v574_v25 = vmul.f32 %v2144_v21, %v135_v23 }
  0x92   :  { %v154_v28 = vadd.f32 %v147_v22, %v142_v24  ;;  %v576_v29 = vadd.f32 %v574_v25, %v147_v22  ;;  %v152_v35 = vpop.permute.xlu1 %151 }
  0x93   :  { %v140_v30 = vpop.permute.xlu0 %139 }
  0x94   :  { %v158_v31 = vmul.f32 %v154_v28, %v154_v28  ;;  %v580_v32 = vmul.f32 %v576_v29, %v576_v29  ;;  %v143_v33 = vmul.f32 %v140_v30, %v2151_v26  ;;  %v575_v34 = vmul.f32 %v2156_v27, %v140_v30 }
  0x95   :  { %v156_v62 = vmul.f32 0.5, %v154_v28  ;;  %v578_v1 = vmul.f32 0.5, %v576_v29 }
  0x96   :  { %v582_v36 = vmul.f32 %v580_v32, %v576_v29  ;;  %v155_v37 = vadd.f32 %v152_v35, %v143_v33  ;;  %v577_v38 = vadd.f32 %v575_v34, %v152_v35  ;;  %v160_v39 = vmul.f32 %v158_v31, %v154_v28  ;;  %v2178_v14 = vpop.permute.xlu1 %182 }
  0x97   :  { %v2176_v13 = vpop.permute.xlu0 %177 }
  0x98   :  { %v584_v40 = vmul.f32 0.044715, %v582_v36  ;;  %v159_v41 = vmul.f32 %v155_v37, %v155_v37  ;;  %v581_v42 = vmul.f32 %v577_v38, %v577_v38  ;;  %v162_v43 = vmul.f32 0.044715, %v160_v39 }
  0x99   :  { %v157_v63 = vmul.f32 0.5, %v155_v37  ;;  %v579_v2 = vmul.f32 0.5, %v577_v38 }
  0x9a   :  { %v583_v44 = vmul.f32 %v581_v42, %v577_v38  ;;  %v161_v45 = vmul.f32 %v159_v41, %v155_v37  ;;  %v586_v46 = vadd.f32 %v584_v40, %v576_v29  ;;  %v164_v47 = vadd.f32 %v162_v43, %v154_v28  ;;  %v2183_v22 = vpop.permute.xlu1 %192 }
  0x9b   :  { %v2180_v15 = vpop.permute.xlu0 %187 }
  0x9c   :  { %v585_v48 = vmul.f32 0.044715, %v583_v44  ;;  %v163_v49 = vmul.f32 0.044715, %v161_v45  ;;  %v588_v50 = vmul.f32 0.7978846, %v586_v46 }
  0x9d   :  { %v166_v51 = vmul.f32 0.7978846, %v164_v47 }
  0x9e   :  { %v165_v52 = vadd.f32 %v163_v49, %v155_v37  ;;  %v587_v53 = vadd.f32 %v585_v48, %v577_v38  ;;  %1845 = vtanh.f32 %v588_v50 }
  0x9f   :  { %1847 = vtanh.f32 %v166_v51 }
  0xa0   :  { %v167_v54 = vmul.f32 0.7978846, %v165_v52  ;;  %v589_v55 = vmul.f32 0.7978846, %v587_v53 }
  0xa2   :  { %1849 = vtanh.f32 %v167_v54 }
  0xa3   :  { %1851 = vtanh.f32 %v589_v55 }
  0xa8   :  { %v1846_v56 = vpop.eup %1845 }
  0xa9   :  { %v1848_v57 = vpop.eup %1847  ;;  %v592_v60 = vadd.f32 1.0, %v1846_v56 }
  0xaa   :  { %v170_v58 = vadd.f32 1.0, %v1848_v57 }
  0xab   :  { %v594_v7 = vmul.f32 %v592_v60, %v578_v1 }
  0xac   :  { %v1850_v59 = vpop.eup %1849  ;;  %v172_v5 = vmul.f32 %v170_v58, %v156_v62 }
  0xad   :  { %v1852_v61 = vpop.eup %1851  ;;  %v171_v0 = vadd.f32 1.0, %v1850_v59 }
  0xae   :  { %v593_v4 = vadd.f32 1.0, %v1852_v61 }
  0xaf   :  { %v173_v6 = vmul.f32 %v171_v0, %v157_v63 }
  0xb0   :  { %v595_v8 = vmul.f32 %v593_v4, %v579_v2 }
  0xb1   :  { %v174_v9 = vpack.c.bf16 %v173_v6, %v172_v5  ;;  %v2191_v5 = vld [vmem:[%s2504_s4 + $0x8] sm:$0xff]   ;;  %v1952_v6 = vmov 0.0  }
  0xb2   :  { %v2160_v10 = vpack.c.bf16 %v595_v8, %v594_v7  ;;  %1696 = vmatprep.subr.bf16.mxu0 %v1952_v6  ;;  %1700 = vmatprep.mubr.msk.bf16.mxu0 %vm1953_vm2, %v1952_v6  ;;  %v2198_v7 = vpop.permute.xlu1 %306 }
  0xb3   :  { %1682 = vmatprep.subr.bf16.mxu1 %v174_v9 }
  0xb4   :  { %1683 = vmatpush3.bf16.msra.mxu1 %v174_v9  ;;  %v2200_v9 = vpop.permute.xlu0 %301 }
  0xb7   :  { %1685 = vmatmul.mubr.msk.bf16.vlgmr.msra.gmra.mrb[0].mxu1 %vm205_vm0, %v2165_v11 }
  0xb8   :  { %1692 = vmatprep.mubr.msk.bf16.mxu1 %vm329_vm1, %v2172_v12 }
 0x18a   :  { %v1686_v16 = vpop.f32.mrb[0].mxu1 }
 0x18b   :  { %v255_v17 = vadd.f32 %v1686_v16, %v2180_v15  ;;  %v246_v18 = vpop.f32.mrb[1].mxu1 }
 0x18c   :  { %v247_v23 = vadd.f32 %v246_v18, %v2176_v13  ;;  %v1687_v24 = vpop.f32.mrb[2].mxu1 }
 0x18d   :  { %v267_v25 = vmul.f32 %v255_v17, %v255_v17  ;;  %v258_v28 = vadd.f32 %v1687_v24, %v2183_v22  ;;  %v249_v29 = vpop.f32.mrb[3].mxu1  ;;  %v263_v56 = vmul.f32 0.5, %v255_v17 }
 0x18e   :  { %v265_v30 = vmul.f32 %v247_v23, %v247_v23  ;;  %v250_v31 = vadd.f32 %v249_v29, %v2178_v14  ;;  %v261_v59 = vmul.f32 0.5, %v247_v23 }
 0x18f   :  { %v271_v32 = vmul.f32 %v267_v25, %v255_v17  ;;  %v268_v33 = vmul.f32 %v258_v28, %v258_v28  ;;  %v264_v57 = vmul.f32 0.5, %v258_v28  ;;  %v2208_v25 = vpop.permute.xlu1 %316 }
 0x190   :  { %v269_v34 = vmul.f32 %v265_v30, %v247_v23  ;;  %v266_v35 = vmul.f32 %v250_v31, %v250_v31  ;;  %v262_v60 = vmul.f32 0.5, %v250_v31  ;;  %v2215_v30 = vpop.permute.xlu0 %311 }
 0x191   :  { %v275_v36 = vmul.f32 0.044715, %v271_v32  ;;  %v272_v37 = vmul.f32 %v268_v33, %v258_v28  ;;  %v2226_v33 = vld [vmem:[%s2470_s8] sm:$0xf] }
 0x192   :  { %v273_v38 = vmul.f32 0.044715, %v269_v34  ;;  %v270_v39 = vmul.f32 %v266_v35, %v250_v31  ;;  %v2242_v34 = vld [vmem:[%s2472_s10] sm:$0xff]  }
 0x193   :  { %v279_v40 = vadd.f32 %v275_v36, %v255_v17  ;;  %v276_v41 = vmul.f32 0.044715, %v272_v37 }
 0x194   :  { %v277_v42 = vadd.f32 %v273_v38, %v247_v23  ;;  %v274_v43 = vmul.f32 0.044715, %v270_v39 }
 0x195   :  { %v283_v44 = vmul.f32 0.7978846, %v279_v40  ;;  %v280_v45 = vadd.f32 %v276_v41, %v258_v28 }
 0x196   :  { %v281_v46 = vmul.f32 0.7978846, %v277_v42  ;;  %v278_v47 = vadd.f32 %v274_v43, %v250_v31 }
 0x197   :  { %1853 = vtanh.f32 %v283_v44  ;;  %v284_v48 = vmul.f32 0.7978846, %v280_v45 }
 0x198   :  { %1855 = vtanh.f32 %v281_v46  ;;  %v282_v49 = vmul.f32 0.7978846, %v278_v47 }
 0x199   :  { %1857 = vtanh.f32 %v284_v48 }
 0x19a   :  { %1859 = vtanh.f32 %v282_v49 }
 0x1a1   :  { %v1854_v50 = vpop.eup %1853 }
 0x1a2   :  { %v1856_v51 = vpop.eup %1855  ;;  %v291_v52 = vadd.f32 1.0, %v1854_v50 }
 0x1a3   :  { %v1858_v53 = vpop.eup %1857  ;;  %v289_v54 = vadd.f32 1.0, %v1856_v51 }
 0x1a4   :  { %v1860_v55 = vpop.eup %1859  ;;  %v292_v58 = vadd.f32 1.0, %v1858_v53  ;;  %v295_v62 = vmul.f32 %v291_v52, %v263_v56 }
 0x1a5   :  { %v290_v61 = vadd.f32 1.0, %v1860_v55  ;;  %v293_v0 = vmul.f32 %v289_v54, %v261_v59 }
 0x1a6   :  { %v296_v63 = vmul.f32 %v292_v58, %v264_v57 }
 0x1a7   :  { %v294_v1 = vmul.f32 %v290_v61, %v262_v60 }
 0x1a8   :  { %v298_v2 = vpack.c.bf16 %v296_v63, %v295_v62 }
 0x1a9   :  { %v297_v4 = vpack.c.bf16 %v294_v1, %v293_v0 }
 0x1ab   :  { %1688 = vmatprep.subr.bf16.mxu1 %v297_v4 }
 0x1ac   :  { %1689 = vmatpush3.bf16.msra.mxu1 %v297_v4 }
 0x1ad   :  { %1690 = vmatprep.subr.bf16.mxu1 %v298_v2 }
 0x1b0   :  { %1691 = vmatpush3.bf16.msra.mxu1 %v298_v2 }
 0x1b3   :  { %1693 = vmatmul.mubr.msk.bf16.vlgmr.msra.gmra.mrb[4].mxu1 %vm329_vm1, %v2191_v5 }
 0x1b4   :  { %1706 = vmatprep.mubr.msk.bf16.mxu1 %vm475_vm3, %v2242_v34 }
 0x286   :  { %v1694_v8 = vpop.f32.mrb[4].mxu1 }
 0x287   :  { %v370_v16 = vpop.f32.mrb[5].mxu1  ;;  %v2218_v31 = vadd.f32 %v1694_v8, %v2215_v30 }
 0x288   :  { %v1695_v17 = vpop.f32.mrb[6].mxu1  ;;  %v2203_v23 = vadd.f32 %v370_v16, %v2200_v9 }
 0x289   :  { %v373_v18 = vpop.f32.mrb[7].mxu1  ;;  %v2211_v28 = vadd.f32 %v1695_v17, %v2208_v25 }
 0x28a   :  { %v2206_v24 = vadd.f32 %v373_v18, %v2198_v7 }
 0x28b   :  { %v386_v32 = vpack.c.bf16 %v2211_v28, %v2218_v31 }
 0x28c   :  { %v385_v29 = vpack.c.bf16 %v2206_v24, %v2203_v23 }
 0x28e   :  { %1697 = vmatpush3.bf16.msra.mxu0 %v385_v29 }
 0x28f   :  { %1698 = vmatprep.subr.bf16.mxu0 %v1952_v6 }
 0x292   :  { %1699 = vmatpush3.bf16.msra.mxu0 %v386_v32  ;;  %v2258_v32 = vld [vmem:[%s2472_s10 + $0x8] sm:$0xff]  }
 0x293   :  { %1710 = vmatprep.subr.bf16.mxu0 %v2160_v10 }
 0x295   :  { %1701 = vmatmul.mubr.msk.bf16.vlgmr.msra.gmra.mrb[0].mxu0 %vm329_vm1, %v2226_v33 }
 0x296   :  { %1711 = vmatpush3.bf16.msra.mxu0 %v2160_v10  ;;  %1712 = vmatprep.mubr.msk.bf16.mxu0 %vm205_vm0, %v2132_v19  ;;  %v2246_v10 = vpop.permute.xlu0 %389 }
 0x297   :  { %1724 = vmatprep.subr.bf16.mxu0 %v1952_v6 }
 0x29d   :  { %1713 = vmatmul.mubr.msk.bf16.vlgmr.msra.gmra.mrb[4].mxu0 %vm205_vm0, %v2165_v11 }
 0x29e   :  { %1728 = vmatprep.mubr.msk.bf16.mxu0 %vm1953_vm2, %v1952_v6 }
 0x368   :  { %v429_v19 = vpop.f32.mrb[0].mxu0 }
 0x369   :  { %v430_v35 = vadd.f32 %v429_v19, %v2246_v10  ;;  %v1702_v36 = vpop.f32.mrb[1].mxu0 }
 0x36a   :  { %v432_v37 = vpop.f32.mrb[2].mxu0 }
 0x36b   :  { %v436_v11 = vmul.f32 %v430_v35, %v430_v35  ;;  %v1703_v38 = vpop.f32.mrb[3].mxu0  ;;  %v435_v8 = vmul.f32 0.5, %v430_v35 }
 0x36d   :  { %v437_v39 = vmul.f32 %v436_v11, %v430_v35 }
 0x36f   :  { %v438_v40 = vmul.f32 0.044715, %v437_v39 }
 0x370   :  { %v1714_v41 = vpop.f32.mrb[4].mxu0 }
 0x371   :  { %v439_v42 = vadd.f32 %v438_v40, %v430_v35  ;;  %v640_v43 = vadd.f32 %v1714_v41, %v2180_v15  ;;  %v631_v44 = vpop.f32.mrb[5].mxu0 }
 0x372   :  { %v632_v45 = vadd.f32 %v631_v44, %v2176_v13  ;;  %v1715_v46 = vpop.f32.mrb[6].mxu0 }
 0x373   :  { %v440_v47 = vmul.f32 0.7978846, %v439_v42  ;;  %v652_v48 = vmul.f32 %v640_v43, %v640_v43  ;;  %v643_v49 = vadd.f32 %v1715_v46, %v2183_v22  ;;  %v634_v50 = vpop.f32.mrb[7].mxu0  ;;  %v648_v39 = vmul.f32 0.5, %v640_v43 }
 0x374   :  { %v650_v51 = vmul.f32 %v632_v45, %v632_v45  ;;  %v635_v52 = vadd.f32 %v634_v50, %v2178_v14  ;;  %v646_v42 = vmul.f32 0.5, %v632_v45 }
 0x375   :  { %1861 = vtanh.f32 %v440_v47  ;;  %v656_v53 = vmul.f32 %v652_v48, %v640_v43  ;;  %v653_v54 = vmul.f32 %v643_v49, %v643_v49  ;;  %v649_v40 = vmul.f32 0.5, %v643_v49 }
 0x376   :  { %v654_v55 = vmul.f32 %v650_v51, %v632_v45  ;;  %v651_v56 = vmul.f32 %v635_v52, %v635_v52  ;;  %v647_v44 = vmul.f32 0.5, %v635_v52 }
 0x377   :  { %v660_v57 = vmul.f32 0.044715, %v656_v53  ;;  %v657_v58 = vmul.f32 %v653_v54, %v643_v49 }
 0x378   :  { %v658_v15 = vmul.f32 0.044715, %v654_v55  ;;  %v655_v59 = vmul.f32 %v651_v56, %v635_v52 }
 0x379   :  { %v664_v60 = vadd.f32 %v660_v57, %v640_v43  ;;  %v661_v13 = vmul.f32 0.044715, %v657_v58  ;;  %v2268_v43 = vpop.permute.xlu1 %447 }
 0x37a   :  { %v662_v61 = vadd.f32 %v658_v15, %v632_v45  ;;  %v659_v62 = vmul.f32 0.044715, %v655_v59  ;;  %v2270_v45 = vpop.permute.xlu0 %452 }
 0x37b   :  { %v668_v63 = vmul.f32 0.7978846, %v664_v60  ;;  %v665_v0 = vadd.f32 %v661_v13, %v643_v49 }
 0x37c   :  { %v666_v22 = vmul.f32 0.7978846, %v662_v61  ;;  %v663_v1 = vadd.f32 %v659_v62, %v635_v52 }
 0x37d   :  { %1863 = vtanh.f32 %v668_v63  ;;  %v669_v2 = vmul.f32 0.7978846, %v665_v0 }
 0x37e   :  { %1865 = vtanh.f32 %v666_v22  ;;  %v667_v14 = vmul.f32 0.7978846, %v663_v1  ;;  %v2275_v56 = vpop.permute.xlu0 %462 }
 0x37f   :  { %v1862_v4 = vpop.eup %1861  ;;  %1867 = vtanh.f32 %v669_v2 }
 0x380   :  { %1869 = vtanh.f32 %v667_v14  ;;  %v442_v16 = vadd.f32 1.0, %v1862_v4 }
 0x382   :  { %v443_v17 = vmul.f32 %v442_v16, %v435_v8 }
 0x384   :  { %v444_v18 = vpack.c.bf16 %v443_v17, %v443_v17 }
 0x386   :  { %1812 = vmatprep.subr.msk.bf16.mxu1 %vm482_vm4, %v444_v18  ;;  %v484_v29 = vsel %vm482_vm4, %v444_v18, 0 }
 0x387   :  { %v1864_v19 = vpop.eup %1863  ;;  %1705 = vmatpush3.bf16.msra.mxu1 %v484_v29 }
 0x388   :  { %v1866_v36 = vpop.eup %1865  ;;  %v676_v37 = vadd.f32 1.0, %v1864_v19 }
 0x389   :  { %v1868_v11 = vpop.eup %1867  ;;  %v674_v35 = vadd.f32 1.0, %v1866_v36 }
 0x38a   :  { %v1870_v38 = vpop.eup %1869  ;;  %1707 = vmatmul.mubr.msk.bf16.vlgmr.msra.gmra.mrb[8].mxu1 %vm475_vm3, %v2258_v32  ;;  %v677_v41 = vadd.f32 1.0, %v1868_v11  ;;  %v680_v47 = vmul.f32 %v676_v37, %v648_v39 }
 0x38b   :  { %v675_v46 = vadd.f32 1.0, %v1870_v38  ;;  %1720 = vmatprep.mubr.msk.bf16.mxu1 %vm329_vm1, %v2172_v12  ;;  %v678_v50 = vmul.f32 %v674_v35, %v646_v42  ;;  %v2272_v12 = vpop.permute.xlu1 %457 }
 0x38c   :  { %v681_v48 = vmul.f32 %v677_v41, %v649_v40 }
 0x38d   :  { %v679_v51 = vmul.f32 %v675_v46, %v647_v44 }
 0x38e   :  { %v683_v53 = vpack.c.bf16 %v681_v48, %v680_v47 }
 0x38f   :  { %v682_v54 = vpack.c.bf16 %v679_v51, %v678_v50 }
 0x391   :  { %1716 = vmatprep.subr.bf16.mxu1 %v682_v54 }
 0x392   :  { %1717 = vmatpush3.bf16.msra.mxu1 %v682_v54 }
 0x393   :  { %1718 = vmatprep.subr.bf16.mxu1 %v683_v53 }
 0x396   :  { %1719 = vmatpush3.bf16.msra.mxu1 %v683_v53 }
 0x399   :  { %1721 = vmatmul.mubr.msk.bf16.vlgmr.msra.gmra.mrb[12].mxu1 %vm329_vm1, %v2191_v5 }
 0x39a   :  { %1734 = vmatprep.mubr.msk.bf16.mxu1 %vm475_vm3, %v2242_v34 }
 0x45d   :  { %v1708_v49 = vpop.f32.mrb[8].mxu1 }
 0x45e   :  { %v529_v52 = vadd.f32 %v1708_v49, %v2272_v12  ;;  %v520_v55 = vpop.f32.mrb[9].mxu1 }
 0x45f   :  { %v521_v57 = vadd.f32 %v520_v55, %v2268_v43  ;;  %v1709_v58 = vpop.f32.mrb[10].mxu1 }
 0x460   :  { %v537_v15 = vsub.f32 0.0, %v529_v52  ;;  %v532_v5 = vadd.f32 %v1709_v58, %v2275_v56  ;;  %v523_v59 = vpop.f32.mrb[11].mxu1 }
 0x461   :  { %v535_v34 = vsub.f32 0.0, %v521_v57  ;;  %v524_v60 = vadd.f32 %v523_v59, %v2270_v45 }
 0x462   :  { %v543_v13 = vmul.f32 1.442695, %v537_v15  ;;  %v538_v61 = vsub.f32 0.0, %v532_v5 }
 0x463   :  { %v539_v62 = vmul.f32 1.442695, %v535_v34  ;;  %v536_v63 = vsub.f32 0.0, %v524_v60 }
 0x464   :  { %1871 = vpow2.f32 %v543_v13  ;;  %v545_v0 = vmul.f32 1.442695, %v538_v61 }
 0x465   :  { %1873 = vpow2.f32 %v539_v62  ;;  %v541_v22 = vmul.f32 1.442695, %v536_v63 }
 0x466   :  { %1875 = vpow2.f32 %v545_v0 }
 0x467   :  { %1877 = vpow2.f32 %v541_v22 }
 0x46c   :  { %v1722_v1 = vpop.f32.mrb[12].mxu1 }
 0x46d   :  { %v718_v2 = vpop.f32.mrb[13].mxu1  ;;  %v2292_v40 = vadd.f32 %v1722_v1, %v2215_v30 }
 0x46e   :  { %v1872_v14 = vpop.eup %1871  ;;  %v1723_v4 = vpop.f32.mrb[14].mxu1  ;;  %v2281_v19 = vadd.f32 %v718_v2, %v2200_v9 }
 0x46f   :  { %v1874_v8 = vpop.eup %1873  ;;  %v549_v16 = vadd.f32 1.0, %v1872_v14  ;;  %v721_v17 = vpop.f32.mrb[15].mxu1  ;;  %v2287_v38 = vadd.f32 %v1723_v4, %v2208_v25 }
 0x470   :  { %v1876_v18 = vpop.eup %1875  ;;  %v547_v29 = vadd.f32 1.0, %v1874_v8  ;;  %v2284_v36 = vadd.f32 %v721_v17, %v2198_v7 }
 0x471   :  { %v1878_v37 = vpop.eup %1877  ;;  %1879 = vrcp.f32 %v549_v16  ;;  %v550_v11 = vadd.f32 1.0, %v1876_v18  ;;  %v734_v7 = vpack.c.bf16 %v2287_v38, %v2292_v40 }
 0x472   :  { %1881 = vrcp.f32 %v547_v29  ;;  %v548_v35 = vadd.f32 1.0, %v1878_v37  ;;  %v733_v39 = vpack.c.bf16 %v2284_v36, %v2281_v19 }
 0x473   :  { %1883 = vrcp.f32 %v550_v11 }
 0x474   :  { %1885 = vrcp.f32 %v548_v35  ;;  %1725 = vmatpush3.bf16.msra.mxu0 %v733_v39 }
 0x475   :  { %1726 = vmatprep.subr.bf16.mxu0 %v1952_v6 }
 0x478   :  { %1727 = vmatpush3.bf16.msra.mxu0 %v734_v7 }
 0x479   :  { %1738 = vmatprep.subr.bf16.mxu0 %v1952_v6 }
 0x47b   :  { %v1880_v9 = vpop.eup %1879  ;;  %1729 = vmatmul.mubr.msk.bf16.vlgmr.msra.gmra.mrb[8].mxu0 %vm329_vm1, %v2226_v33 }
 0x47c   :  { %v1882_v25 = vpop.eup %1881  ;;  %v2301_v41 = vmul.f32 %v1880_v9, %v2218_v31  ;;  %1742 = vmatprep.mubr.msk.bf16.mxu0 %vm1953_vm2, %v1952_v6 }
 0x47d   :  { %v1884_v30 = vpop.eup %1883  ;;  %v2306_v42 = vmul.f32 %v1882_v25, %v2203_v23 }
 0x47e   :  { %v1886_v44 = vpop.eup %1885  ;;  %563 = vadd.xlane.f32.xlu0 %v2301_v41  ;;  %v2314_v33 = vmul.f32 %v1884_v30, %v2211_v28  ;;  %v113_v30 = vld [vmem:[%s2477_s15 + $0x10] sm:$0xff] }
 0x47f   :  { %559 = vadd.xlane.f32.xlu1 %v2306_v42  ;;  %v2311_v46 = vmul.f32 %v1886_v44, %v2206_v24  ;;  %v114_v44 = vld [vmem:[%s2477_s15 + $0x18] sm:$0xff] }
 0x482   :  { %561 = vadd.xlane.f32.xlu0 %v2311_v46 }
 0x483   :  { %565 = vadd.xlane.f32.xlu1 %v2314_v33 }
 0x54e   :  { %v769_v31 = vpop.f32.mrb[8].mxu0 }
 0x54f   :  { %v770_v47 = vadd.f32 %v769_v31, %v2246_v10  ;;  %v1730_v23 = vpop.f32.mrb[9].mxu0  ;;  %v122_v31 = vld [vmem:[%s2481_s19 + $0x8] sm:$0xff] }
 0x550   :  { %v772_v48 = vpop.f32.mrb[10].mxu0  ;;  %v564_v23 = vpop.xlane.xlu0 %563 }
 0x551   :  { %v776_v50 = vmul.f32 %v770_v47, %v770_v47  ;;  %v1731_v51 = vpop.f32.mrb[11].mxu0  ;;  %v775_v55 = vmul.f32 0.5, %v770_v47  ;;  %v560_v48 = vpop.xlane.xlu1 %559 }
 0x553   :  { %v777_v53 = vmul.f32 %v776_v50, %v770_v47 }
 0x554   :  { %v562_v50 = vpop.xlane.xlu0 %561 }
 0x555   :  { %v778_v54 = vmul.f32 0.044715, %v777_v53  ;;  %v566_v51 = vpop.xlane.xlu1 %565 }
 0x557   :  { %v779_v49 = vadd.f32 %v778_v54, %v770_v47  ;;  %v121_v47 = vld [vmem:[%s2481_s19] sm:$0xff] }
 0x559   :  { %v780_v52 = vmul.f32 0.7978846, %v779_v49 }
 0x55b   :  { %1887 = vtanh.f32 %v780_v52  ;;  %v567_v52 = vmul.f32 0.0078125, %v560_v48 }
 0x565   :  { %v1888_v24 = vpop.eup %1887 }
 0x566   :  { %v782_v28 = vadd.f32 1.0, %v1888_v24  ;;  %v568_v24 = vmul.f32 0.0078125, %v562_v50 }
 0x568   :  { %v783_v57 = vmul.f32 %v782_v28, %v775_v55 }
 0x56a   :  { %v784_v58 = vpack.c.bf16 %v783_v57, %v783_v57 }
 0x56c   :  { %1813 = vmatprep.subr.msk.bf16.mxu1 %vm482_vm4, %v784_v58  ;;  %v786_v15 = vsel %vm482_vm4, %v784_v58, 0 }
 0x56d   :  { %1733 = vmatpush3.bf16.msra.mxu1 %v786_v15 }
 0x570   :  { %1735 = vmatmul.mubr.msk.bf16.vlgmr.msra.gmra.mrb[16].mxu1 %vm475_vm3, %v2258_v32 }
 0x643   :  { %v1736_v10 = vpop.f32.mrb[16].mxu1 }
 0x644   :  { %v831_v5 = vadd.f32 %v1736_v10, %v2272_v12  ;;  %v822_v59 = vpop.f32.mrb[17].mxu1 }
 0x645   :  { %v823_v34 = vadd.f32 %v822_v59, %v2268_v43  ;;  %v1737_v60 = vpop.f32.mrb[18].mxu1  ;;  %v1048_v59 = vld [vmem:[%s2505_s23] sm:$0xff] }
 0x646   :  { %v839_v13 = vsub.f32 0.0, %v831_v5  ;;  %v834_v61 = vadd.f32 %v1737_v60, %v2275_v56  ;;  %v825_v62 = vpop.f32.mrb[19].mxu1  ;;  %v570_v60 = vmul.f32 0.0078125, %v566_v51 }
 0x647   :  { %v837_v63 = vsub.f32 0.0, %v823_v34  ;;  %v826_v0 = vadd.f32 %v825_v62, %v2270_v45  ;;  %v569_v34 = vmul.f32 0.0078125, %v564_v23 }
 0x648   :  { %v845_v22 = vmul.f32 1.442695, %v839_v13  ;;  %v840_v1 = vsub.f32 0.0, %v834_v61 }
 0x649   :  { %v841_v2 = vmul.f32 1.442695, %v837_v63  ;;  %v838_v14 = vsub.f32 0.0, %v826_v0  ;;  %v1049_v63 = vpack.c.bf16 %v1048_v59, %v1048_v59 }
 0x64a   :  { %1889 = vpow2.f32 %v845_v22  ;;  %v847_v32 = vmul.f32 1.442695, %v840_v1  ;;  %v105_v22 = vld [vmem:[%s2474_s12] sm:$0x3] }
 0x64b   :  { %1891 = vpow2.f32 %v841_v2  ;;  %v843_v4 = vmul.f32 1.442695, %v838_v14  ;;  %v1059_v1 = vsel %vm482_vm4, %v1049_v63, 0  ;;  %v1592_v2 = vld [vmem:[%s2505_s23 + $0x8] sm:$0xff] }
 0x64c   :  { %1893 = vpow2.f32 %v847_v32  ;;  %v1328_v14 = vpack.c.bf16 %v1592_v2, %v1592_v2  ;;  %v115_v32 = vld [vmem:[%s2478_s16] sm:$0x3] }
 0x64d   :  { %1895 = vpow2.f32 %v843_v4 }
 0x64e   :  { %v1330_v4 = vsel %vm482_vm4, %v1328_v14, 0  ;;  %v1842_v14 = vld [vmem:[%s2480_s18 + $0x8] sm:$0xff]  }
 0x654   :  { %v1890_v12 = vpop.eup %1889 }
 0x655   :  { %v1892_v43 = vpop.eup %1891  ;;  %v851_v8 = vadd.f32 1.0, %v1890_v12  ;;  %v1839_v12 = vld [vmem:[%s2476_s14] sm:$0xff]  }
 0x656   :  { %v1894_v16 = vpop.eup %1893  ;;  %v849_v17 = vadd.f32 1.0, %v1892_v43  ;;  %1748 = vmatprep.mubr.msk.bf16.mxu1 %vm968_vm6, %v1839_v12  ;;  %v1841_v43 = vld [vmem:[%s2480_s18] sm:$0xff]  }
 0x657   :  { %v1896_v56 = vpop.eup %1895  ;;  %v852_v18 = vadd.f32 1.0, %v1894_v16 }
 0x658   :  { %1897 = vrcp.f32 %v849_v17  ;;  %v850_v29 = vadd.f32 1.0, %v1896_v56 }
 0x659   :  { %1899 = vrcp.f32 %v851_v8 }
 0x65a   :  { %1901 = vrcp.f32 %v850_v29 }
 0x65b   :  { %1903 = vrcp.f32 %v852_v18 }
 0x662   :  { %v1898_v45 = vpop.eup %1897 }
 0x663   :  { %v1900_v37 = vpop.eup %1899  ;;  %v2328_v11 = vmul.f32 %v1898_v45, %v2281_v19  ;;  %v116_v19 = vld [vmem:[%s2479_s17] sm:$0xf] }
 0x664   :  { %v1902_v35 = vpop.eup %1901  ;;  %v2336_v9 = vmul.f32 %v1900_v37, %v2292_v40  ;;  %v111_v40 = vld [vmem:[%s2477_s15] sm:$0xff] }
 0x665   :  { %861 = vadd.xlane.f32.xlu0 %v2328_v11  ;;  %v2332_v39 = vmul.f32 %v1902_v35, %v2284_v36  ;;  %v1904_v7 = vpop.eup %1903  ;;  %v106_v36 = vld [vmem:[%s2475_s13] sm:$0xf] }
 0x666   :  { %v2340_v25 = vmul.f32 %v1904_v7, %v2287_v38  ;;  %v112_v38 = vld [vmem:[%s2477_s15 + $0x8] sm:$0xff] }
 0x667   :  { %863 = vadd.xlane.f32.xlu1 %v2332_v39 }
 0x669   :  { %865 = vadd.xlane.f32.xlu0 %v2336_v9 }
 0x66b   :  { %867 = vadd.xlane.f32.xlu1 %v2340_v25 }
 0x67c   :  { %1052 = vperm.xlu1 %1825, %v116_v19  }
 0x67f   :  { %882 = vperm.xlu0 %1824, %v106_v36  }
 0x680   :  { %940 = vperm.xlu1 %1825, %v111_v40  }
 0x683   :  { %945 = vperm.xlu0 %1824, %v112_v38  }
 0x684   :  { %950 = vperm.xlu1 %1825, %v113_v30  }
 0x687   :  { %955 = vperm.xlu0 %1824, %v114_v44  }
 0x688   :  { %1118 = vperm.xlu1 %1825, %v122_v31  }
 0x68b   :  { %1113 = vperm.xlu0 %1824, %v121_v47  }
 0x6f2   :  { %v862_v53 = vpop.xlane.xlu0 %861 }
 0x6f3   :  { %v869_v54 = vmul.f32 0.0078125, %v862_v53 }
 0x6f4   :  { %v864_v49 = vpop.xlane.xlu1 %863 }
 0x6f5   :  { %v870_v55 = vmul.f32 0.0078125, %v864_v49  ;;  %v874_v57 = vsel %vm873_vm5, %v567_v52, %v869_v54 }
 0x6f6   :  { %v866_v28 = vpop.xlane.xlu0 %865 }
 0x6f7   :  { %v875_v58 = vsel %vm873_vm5, %v568_v24, %v870_v55  ;;  %v871_v15 = vmul.f32 0.0078125, %v866_v28 }
 0x6f8   :  { %v878_v10 = vpack.c.bf16 %v875_v58, %v874_v57  ;;  %v868_v5 = vpop.xlane.xlu1 %867 }
 0x6f9   :  { %v872_v13 = vmul.f32 0.0078125, %v868_v5  ;;  %v876_v61 = vsel %vm873_vm5, %v569_v34, %v871_v15 }
 0x6fa   :  { %1739 = vmatpush3.bf16.msra.mxu0 %v878_v10 }
 0x6fb   :  { %v877_v62 = vsel %vm873_vm5, %v570_v60, %v872_v13  ;;  %1740 = vmatprep.subr.bf16.mxu0 %v1952_v6  ;;  %v1840_v13 = vld [vmem:[%s2476_s14 + $0x8] sm:$0xff]  }
 0x6fc   :  { %v879_v0 = vpack.c.bf16 %v877_v62, %v876_v61  ;;  %v1053_v35 = vpop.permute.xlu1 %1052 }
 0x6fe   :  { %1741 = vmatpush3.bf16.msra.mxu0 %v879_v0  ;;  %v883_v8 = vpop.permute.xlu0 %882 }
 0x6ff   :  { %1752 = vmatprep.subr.bf16.mxu0 %v1952_v6 }
 0x701   :  { %1743 = vmatmul.mubr.msk.bf16.vlgmr.msra.gmra.mrb[12].mxu0 %vm329_vm1, %v105_v22  ;;  %v1199_v22 = vpack.c.bf16 %v2151_v26, %v2139_v20  ;;  %v1436_v26 = vpack.c.bf16 %v2156_v27, %v2144_v21  ;;  %v941_v21 = vpop.permute.xlu1 %940 }
 0x702   :  { %1753 = vmatpush3.bf16.msra.mxu0 %v1059_v1  ;;  %1754 = vmatprep.mubr.msk.bf16.mxu0 %vm1953_vm2, %v1952_v6  ;;  %v946_v27 = vpop.permute.xlu0 %945 }
 0x703   :  { %1770 = vmatprep.subr.bf16.mxu0 %v1952_v6 }
 0x709   :  { %1755 = vmatmul.mubr.msk.bf16.vlgmr.msra.gmra.mrb[16].mxu0 %vm475_vm3, %v115_v32 }
 0x70a   :  { %1771 = vmatpush3.bf16.msra.mxu0 %v1330_v4  ;;  %1772 = vmatprep.mubr.msk.bf16.mxu0 %vm1953_vm2, %v1952_v6  ;;  %v1843_v4 = vld [vmem:[%s2482_s20] sm:$0xff]  }
 0x711   :  { %1773 = vmatmul.mubr.msk.bf16.vlgmr.msra.gmra.mrb[20].mxu0 %vm475_vm3, %v115_v32 }
 0x712   :  { %1778 = vmatprep.mubr.msk.bf16.mxu0 %vm968_vm6, %v1841_v43 }
 0x7d4   :  { %v922_v16 = vpop.f32.mrb[12].mxu0 }
 0x7d5   :  { %v923_v17 = vadd.f32 %v922_v16, %v883_v8  ;;  %v1744_v56 = vpop.f32.mrb[13].mxu0 }
 0x7d6   :  { %v925_v6 = vpop.f32.mrb[14].mxu0  ;;  %v951_v56 = vpop.permute.xlu1 %950 }
 0x7d7   :  { %v929_v18 = vmul.f32 %v923_v17, %v923_v17  ;;  %v1745_v29 = vpop.f32.mrb[15].mxu0  ;;  %v928_v58 = vmul.f32 0.5, %v923_v17 }
 0x7d9   :  { %v930_v45 = vmul.f32 %v929_v18, %v923_v17 }
 0x7db   :  { %v931_v37 = vmul.f32 0.044715, %v930_v45  ;;  %v956_v45 = vpop.permute.xlu0 %955 }
 0x7dc   :  { %v1095_v7 = vpop.f32.mrb[16].mxu0 }
 0x7dd   :  { %v932_v19 = vadd.f32 %v931_v37, %v923_v17  ;;  %v1096_v36 = vadd.f32 %v1095_v7, %v1053_v35  ;;  %v1756_v40 = vpop.f32.mrb[17].mxu0  ;;  %v1844_v17 = vld [vmem:[%s2482_s20 + $0x8] sm:$0xff]  }
 0x7de   :  { %v1098_v38 = vpop.f32.mrb[18].mxu0 }
 0x7df   :  { %v933_v30 = vmul.f32 0.7978846, %v932_v19  ;;  %v1102_v44 = vmul.f32 %v1096_v36, %v1096_v36  ;;  %v1757_v31 = vpop.f32.mrb[19].mxu0  ;;  %v1101_v62 = vmul.f32 0.5, %v1096_v36 }
 0x7e1   :  { %1905 = vtanh.f32 %v933_v30  ;;  %v1103_v47 = vmul.f32 %v1102_v44, %v1096_v36 }
 0x7e3   :  { %v1104_v23 = vmul.f32 0.044715, %v1103_v47 }
 0x7e4   :  { %v1366_v48 = vpop.f32.mrb[20].mxu0 }
 0x7e5   :  { %v1105_v50 = vadd.f32 %v1104_v23, %v1096_v36  ;;  %v1367_v51 = vadd.f32 %v1366_v48, %v1053_v35  ;;  %v1774_v53 = vpop.f32.mrb[21].mxu0 }
 0x7e6   :  { %v1369_v54 = vpop.f32.mrb[22].mxu0 }
 0x7e7   :  { %v1106_v49 = vmul.f32 0.7978846, %v1105_v50  ;;  %v1373_v52 = vmul.f32 %v1367_v51, %v1367_v51  ;;  %v1775_v24 = vpop.f32.mrb[23].mxu0  ;;  %v1372_v12 = vmul.f32 0.5, %v1367_v51 }
 0x7e9   :  { %1907 = vtanh.f32 %v1106_v49  ;;  %v1374_v55 = vmul.f32 %v1373_v52, %v1367_v51 }
 0x7eb   :  { %v1906_v28 = vpop.eup %1905  ;;  %v1375_v57 = vmul.f32 0.044715, %v1374_v55 }
 0x7ec   :  { %v935_v15 = vadd.f32 1.0, %v1906_v28 }
 0x7ed   :  { %v1376_v10 = vadd.f32 %v1375_v57, %v1367_v51 }
 0x7ee   :  { %v936_v5 = vmul.f32 %v935_v15, %v928_v58  ;;  %v1954_v58 = vmov 1  }
 0x7ef   :  { %v1377_v59 = vmul.f32 0.7978846, %v1376_v10 }
 0x7f0   :  { %v937_v34 = vpack.c.bf16 %v936_v5, %v936_v5 }
 0x7f1   :  { %1909 = vtanh.f32 %v1377_v59 }
 0x7f2   :  { %1814 = vmatprep.subr.msk.bf16.mxu1 %vm975_vm7, %v937_v34  ;;  %v977_v60 = vsel %vm975_vm7, %v937_v34, 0 }
 0x7f3   :  { %v1908_v61 = vpop.eup %1907  ;;  %1747 = vmatpush3.bf16.msra.mxu1 %v977_v60 }
 0x7f4   :  { %v1108_v63 = vadd.f32 1.0, %v1908_v61 }
 0x7f6   :  { %1749 = vmatmul.mubr.msk.bf16.vlgmr.msra.gmra.mrb[20].mxu1 %vm968_vm6, %v1840_v13  ;;  %v1109_v0 = vmul.f32 %v1108_v63, %v1101_v62 }
 0x7f7   :  { %1760 = vmatprep.mubr.msk.bf16.mxu1 %vm968_vm6, %v1841_v43 }
 0x7f8   :  { %v1110_v1 = vpack.c.bf16 %v1109_v0, %v1109_v0  ;;  %v124_v0 = vld [vmem:[%s2481_s19 + $0x18] sm:$0xff] }
 0x7fa   :  { %1815 = vmatprep.subr.msk.bf16.mxu1 %vm975_vm7, %v1110_v1  ;;  %v1148_v2 = vsel %vm975_vm7, %v1110_v1, 0  ;;  %v1587_v1 = vld [vmem:[#allocation2] ss:$0 sm:$0xff] }
 0x7fb   :  { %v1910_v32 = vpop.eup %1909  ;;  %1759 = vmatpush3.bf16.msra.mxu1 %v1148_v2  ;;  %v1119_v2 = vpop.permute.xlu1 %1118 }
 0x7fc   :  { %v1379_v43 = vadd.f32 1.0, %v1910_v32  ;;  %1764 = vmatprep.subr.bf16.mxu1 %v1199_v22 }
 0x7fe   :  { %v1380_v8 = vmul.f32 %v1379_v43, %v1372_v12  ;;  %1761 = vmatmul.mubr.msk.bf16.vlgmr.msra.gmra.mrb[24].mxu1 %vm968_vm6, %v1842_v14 }
 0x7ff   :  { %1765 = vmatpush3.bf16.msra.mxu1 %v1199_v22  ;;  %1766 = vmatprep.mubr.msk.bf16.mxu1 %vm205_vm0, %v1843_v4  ;;  %v123_v22 = vld [vmem:[%s2481_s19 + $0x10] sm:$0xff]  ;;  %s1955_s19 = smov [#allocation3]  }
 0x800   :  { %v1381_v20 = vpack.c.bf16 %v1380_v8, %v1380_v8  ;;  %s1540_s13 = sshll.u32 %s1955_s19, 4  ;;  %s1541_s13 = int_to_ptr.vmem [resolvable:$true] %s1540_s13 }
 0x801   :  { %s1927_s30 = scalar_lea.vmem %s1541_s13, 512  ;;  %p1932_p1 = scmp.lt.s32.totalorder %s1541_s13, %s1541_s13 }
 0x802   :  { %1816 = vmatprep.subr.msk.bf16.mxu0 %vm975_vm7, %v1381_v20  ;;  %v1383_v16 = vsel %vm975_vm7, %v1381_v20, 0  ;;  %p1928_p0 = scmp.ne.s32.totalorder %s1541_s13, %s1927_s30  ;;  %p1933_p2 = scmp.lt.s32.totalorder %s1927_s30, %s1927_s30 }
 0x803   :  { %1777 = vmatpush3.bf16.msra.mxu0 %v1383_v16 }
 0x804   :  { %1782 = vmatprep.subr.bf16.mxu0 %v1436_v26  ;;  %p1934_p3 = por %p1933_p2, %p1932_p1 }
 0x806   :  { %1779 = vmatmul.mubr.msk.bf16.vlgmr.msra.gmra.mrb[24].mxu0 %vm968_vm6, %v1842_v14  ;;  %v1114_v14 = vpop.permute.xlu0 %1113  ;;  %p1935_p4 = pnand %p1934_p3, %p1928_p0 }
 0x807   :  { %1783 = vmatpush3.bf16.msra.mxu0 %v1436_v26  ;;  %1784 = vmatprep.mubr.msk.bf16.mxu0 %vm205_vm0, %v1843_v4 }
 0x80a   :  { %1767 = vmatmul.mubr.msk.bf16.vlgmr.msra.gmra.mrb[24].mxu1 %vm205_vm0, %v1844_v17 }
 0x812   :  { %1785 = vmatmul.mubr.msk.bf16.vlgmr.msra.gmra.mrb[24].mxu0 %vm205_vm0, %v1844_v17 }
 0x8c9   :  { %v1750_v6 = vpop.f32.mrb[20].mxu1 }
 0x8ca   :  { %v1022_v18 = vadd.f32 %v1750_v6, %v951_v56  ;;  %v1013_v29 = vpop.f32.mrb[21].mxu1 }
 0x8cb   :  { %v1014_v37 = vadd.f32 %v1013_v29, %v941_v21  ;;  %v1751_v35 = vpop.f32.mrb[22].mxu1 }
 0x8cc   :  { %v1030_v7 = vsub.f32 0.0, %v1022_v18  ;;  %v1025_v19 = vadd.f32 %v1751_v35, %v956_v45  ;;  %v1016_v36 = vpop.f32.mrb[23].mxu1 }
 0x8cd   :  { %v1017_v40 = vadd.f32 %v1016_v36, %v946_v27  ;;  %v1028_v30 = vsub.f32 0.0, %v1014_v37 }
 0x8ce   :  { %v1036_v38 = vmul.f32 1.442695, %v1030_v7  ;;  %v1031_v44 = vsub.f32 0.0, %v1025_v19 }
 0x8cf   :  { %v1029_v31 = vsub.f32 0.0, %v1017_v40  ;;  %v1032_v48 = vmul.f32 1.442695, %v1028_v30 }
 0x8d0   :  { %1911 = vpow2.f32 %v1036_v38  ;;  %v1038_v47 = vmul.f32 1.442695, %v1031_v44 }
 0x8d1   :  { %v1034_v23 = vmul.f32 1.442695, %v1029_v31 }
 0x8d2   :  { %1913 = vpow2.f32 %v1038_v47 }
 0x8d3   :  { %1915 = vpow2.f32 %v1034_v23 }
 0x8d4   :  { %1917 = vpow2.f32 %v1032_v48 }
 0x8da   :  { %v1912_v50 = vpop.eup %1911 }
 0x8db   :  { %v1042_v51 = vadd.f32 1.0, %v1912_v50 }
 0x8dc   :  { %v1914_v53 = vpop.eup %1913 }
 0x8dd   :  { %v1916_v54 = vpop.eup %1915  ;;  %1919 = vrcp.f32 %v1042_v51  ;;  %v1043_v49 = vadd.f32 1.0, %v1914_v53  ;;  %v1768_v10 = vpop.f32.mrb[24].mxu1 }
 0x8de   :  { %v1041_v52 = vadd.f32 1.0, %v1916_v54  ;;  %v1918_v24 = vpop.eup %1917  ;;  %v1274_v5 = vpop.f32.mrb[25].mxu1 }
 0x8df   :  { %1921 = vrcp.f32 %v1043_v49  ;;  %v1040_v55 = vadd.f32 1.0, %v1918_v24  ;;  %v1769_v59 = vpop.f32.mrb[26].mxu1 }
 0x8e0   :  { %1923 = vrcp.f32 %v1041_v52  ;;  %v1277_v13 = vpop.f32.mrb[27].mxu1 }
 0x8e1   :  { %1925 = vrcp.f32 %v1040_v55 }
 0x8e5   :  { %v1786_v34 = vpop.f32.mrb[24].mxu0 }
 0x8e6   :  { %v1491_v61 = vpop.f32.mrb[25].mxu0 }
 0x8e7   :  { %v1920_v28 = vpop.eup %1919  ;;  %v1787_v62 = vpop.f32.mrb[26].mxu0 }
 0x8e8   :  { %1212 = vperm.xlu1 %1825, %v1920_v28   ;;  %v1494_v63 = vpop.f32.mrb[27].mxu0 }
 0x8e9   :  { %v1922_v57 = vpop.eup %1921 }
 0x8ea   :  { %1217 = vperm.xlu0 %1824, %v1922_v57   ;;  %v1924_v15 = vpop.eup %1923 }
 0x8eb   :  { %v1926_v60 = vpop.eup %1925 }
 0x8ec   :  { %1826 = vset.pattern.permute.xlu1 %v1954_v58 }
 0x8ed   :  { %1446 = vperm.xlu1 %1826, %v1920_v28  }
 0x8ee   :  { %1207 = vperm.xlu0 %1824, %v1924_v15  }
 0x8f1   :  { %1827 = vset.pattern.permute.xlu1 %v1951_v3 }
 0x8f2   :  { %1202 = vperm.xlu1 %1827, %v1926_v60   ;;  %1830 = vset.pattern.permute.xlu0 %v1954_v58 }
 0x8f3   :  { %1442 = vperm.xlu0 %1830, %v1924_v15  }
 0x8f6   :  { %1828 = vset.pattern.permute.xlu1 %v1954_v58 }
 0x8f7   :  { %1438 = vperm.xlu1 %1828, %v1926_v60   ;;  %1831 = vset.pattern.permute.xlu0 %v1951_v3 }
 0x8f8   :  { %1128 = vperm.xlu0 %1831, %v124_v0  }
 0x8fb   :  { %1450 = vperm.xlu1 %1828, %v1922_v57  }
 0x8fc   :  { %1832 = vset.pattern.permute.xlu0 %v1954_v58 }
 0x8ff   :  { %1829 = vset.pattern.permute.xlu1 %v1951_v3 }
 0x900   :  { %1123 = vperm.xlu1 %1829, %v123_v22  }
 0x904   :  { %1299 = vperm.xlu1 %1829, %v1587_v1  }
 0x967   :  { %v1213_v32 = vpop.permute.xlu1 %1212 }
 0x968   :  { %v1222_v45 = vmul.f32 %v1213_v32, %v2301_v41 }
 0x969   :  { %v1218_v4 = vpop.permute.xlu0 %1217 }
 0x96a   :  { %v1223_v18 = vmul.f32 %v1218_v4, %v2314_v33 }
 0x96c   :  { %v1447_v12 = vpop.permute.xlu1 %1446 }
 0x96d   :  { %v1208_v43 = vpop.permute.xlu0 %1207  ;;  %v1455_v37 = vmul.f32 %v1447_v12, %v2336_v9 }
 0x96e   :  { %v1221_v16 = vmul.f32 %v1208_v43, %v2311_v46 }
 0x970   :  { %v1794_v29 = vadd.f32 %v1221_v16, %v1119_v2 }
 0x971   :  { %v1203_v8 = vpop.permute.xlu1 %1202 }
 0x972   :  { %v1443_v20 = vpop.permute.xlu0 %1442  ;;  %v1220_v17 = vmul.f32 %v1203_v8, %v2306_v42  ;;  %v1795_v38 = vadd.f32 %v1794_v29, %v1277_v13 }
 0x973   :  { %v1454_v27 = vmul.f32 %v1443_v20, %v2332_v39 }
 0x974   :  { %v1790_v35 = vadd.f32 %v1220_v17, %v1114_v14 }
 0x975   :  { %v1802_v46 = vadd.f32 %v1454_v27, %v1119_v2 }
 0x976   :  { %v1439_v26 = vpop.permute.xlu1 %1438 }
 0x977   :  { %v1453_v3 = vmul.f32 %v1439_v26, %v2328_v11  ;;  %v1129_v56 = vpop.permute.xlu0 %1128  ;;  %v1791_v11 = vadd.f32 %v1790_v35, %v1274_v5  ;;  %v1803_v31 = vadd.f32 %v1802_v46, %v1494_v63 }
 0x978   :  { %v1792_v7 = vadd.f32 %v1223_v18, %v1129_v56 }
 0x979   :  { %v1798_v19 = vadd.f32 %v1453_v3, %v1114_v14 }
 0x97a   :  { %v1451_v21 = vpop.permute.xlu1 %1450  ;;  %v1793_v30 = vadd.f32 %v1792_v7, %v1769_v59 }
 0x97b   :  { %v1456_v6 = vmul.f32 %v1451_v21, %v2340_v25  ;;  %v1799_v33 = vadd.f32 %v1798_v19, %v1491_v61 }
 0x97d   :  { %v1800_v42 = vadd.f32 %v1456_v6, %v1129_v56 }
 0x97f   :  { %v1124_v36 = vpop.permute.xlu1 %1123  ;;  %v1801_v47 = vadd.f32 %v1800_v42, %v1787_v62 }
 0x980   :  { %v1788_v40 = vadd.f32 %v1222_v45, %v1124_v36  ;;  %v1796_v39 = vadd.f32 %v1455_v37, %v1124_v36 }
 0x982   :  { %v1789_v44 = vadd.f32 %v1788_v40, %v1768_v10  ;;  %v1797_v25 = vadd.f32 %v1796_v39, %v1786_v34 }
 0x983   :  { %v1300_v23 = vpop.permute.xlu1 %1299 }
 0x984   :  { %v1302_v41 = vmul.f32 %v1791_v11, %v1300_v23  ;;  %v1303_v9 = vmul.f32 %v1795_v38, %v1300_v23  ;;  %v1304_v48 = vmul.f32 %v1789_v44, %v1300_v23  ;;  %v1305_v50 = vmul.f32 %v1793_v30, %v1300_v23 }
 0x985   :  { %v1510_v51 = vmul.f32 %v1799_v33, %v1300_v23  ;;  %v1511_v53 = vmul.f32 %v1803_v31, %v1300_v23  ;;  %v1512_v54 = vmul.f32 %v1797_v25, %v1300_v23  ;;  %v1513_v49 = vmul.f32 %v1801_v47, %v1300_v23 }
 0x986   :  { %v1615_v52 = vpack.c.bf16 %v1303_v9, %v1302_v41  ;;  %v1620_v24 = vpack.c.bf16 %v1305_v50, %v1304_v48 }
 0x987   :  { %v1625_v55 = vpack.c.bf16 %v1511_v53, %v1510_v51  ;;  %v1630_v28 = vpack.c.bf16 %v1513_v49, %v1512_v54 }
 0x988   :  { %1616 = vst [vmem:[#allocation3] sm:$0xff] %v1615_v52   ;;  %1632 = vst [vmem:[#allocation3 + $0x8] sm:$0xff] %v1620_v24  }
 0x989   :  { %1626 = vst [vmem:[#allocation3 + $0x10] sm:$0xff] %v1625_v55   ;;  %1633 = vst [vmem:[#allocation3 + $0x18] sm:$0xff] %v1630_v28  }
 0x98a   :  { %1938 = shalt.err (!%p1935_p4)
}
 0x98b   :  { %s1939_s15 = scalar_lea.hbm %s2484_s22, 512 }
 0x98c   :  { %p1940_p5 = scmp.ne.s32.totalorder %s2484_s22, %s1939_s15  ;;  %p1943_p6 = scmp.lt.u32.totalorder %s1939_s15, %s2484_s22 }
 0x98e   :  { %p1945_p7 = pnand %p1943_p6, %p1940_p5 }
 0x990   :  { %1948 = shalt.err (!%p1945_p7)
}
 0x991   :  { %s1956_s9 = smov 64   ;;  %s1957_s5 = smov 4  }
 0x992   :  { %1546 = dma.vmem_to_hbm [thread:$0]  %s1541_s13, 512, %s2484_s22, [#allocation4], %s1956_s9, %s1956_s9, %s1957_s5  }
 0x993   :  { %1949 = dma.done.wait [#allocation4], 512  }
 0x994   :  { %1950 = vsyncadd [#allocation4], 4294966784 }
 0x995   :  { %1550 = vsyncpa [#allocation4], 1 }

</bundles_post_ra>
